<compile_context>
chip_gen: v6e
topology: v6e:2x2x1
jax: 0.10.0
libtpu: 0.0.40
codegen_flags: <defaults>
</compile_context>

<pallas_src>
import functools

import jax
import jax.numpy as jnp
from jax.experimental import pallas as pl
from jax.experimental.pallas import tpu as pltpu


# -----------------------------------------------------------------------------
# Fused whole-model kernel
# -----------------------------------------------------------------------------
def _news_click_kernel(*refs, batch, seq, hidden, heads, layers):
    """Whole NewsClickModel forward in one kernel; all operands in VMEM."""
    dh = hidden // heads
    scale = 1.0 / float(dh) ** 0.5

    o_ref = refs[-1]
    it = iter(refs[:-1])
    ids_ref = next(it)       # (B*S, 1)  int32 token ids (row-major over B, S)
    mask_ref = next(it)      # (B, S)    float32 attention mask
    word_ref = next(it)      # (vocab, H)
    pos_ref = next(it)       # (max_pos, H)
    type_ref = next(it)      # (type_vocab, H)
    emb_g_ref = next(it)     # (1, H)
    emb_b_ref = next(it)     # (1, H)
    layer_refs = [tuple(next(it) for _ in range(12)) for _ in range(layers)]
    wp_ref = next(it)        # (H, H)   pooler
    bp_ref = next(it)        # (1, H)
    wc_ref = next(it)        # (H, num_labels)
    bc_ref = next(it)        # (1, num_labels)

    def layer_norm(x, g, beta):
        mu = jnp.mean(x, axis=-1, keepdims=True)
        var = jnp.mean(jnp.square(x - mu), axis=-1, keepdims=True)
        return (x - mu) * jax.lax.rsqrt(var + 1e-12) * g + beta

    rows = batch * seq
    vocab = word_ref.shape[0]

    # --- embeddings: in-VMEM "gather" expressed as a one-hot matmul (MXU) ---
    ids = ids_ref[...]                                             # (rows, 1)
    onehot = (jax.lax.broadcasted_iota(jnp.int32, (rows, vocab), 1) == ids
              ).astype(jnp.float32)                                # (rows, vocab)
    x = jnp.dot(onehot, word_ref[...], preferred_element_type=jnp.float32)
    pos = pos_ref[0:seq, :]                                        # (S, H)
    # TODO(synk): token_type_ids assumed all-zero (single segment), as in the
    # original wrapper usage; only type_emb[0] is added.
    x = x + jnp.concatenate([pos] * batch, axis=0) + type_ref[0:1, :]
    x = layer_norm(x, emb_g_ref[...], emb_b_ref[...])              # (rows, H)

    # --- additive attention-mask bias, computed once in VMEM ---
    bias = (1.0 - mask_ref[...]) * -1e9                            # (B, S)

    for (wqkv, bqkv, wo, bo, g1, be1, wi, bint, wo2, bo2, g2, be2) in layer_refs:
        # fused Q/K/V projection: single (rows, H) x (H, 3H) matmul
        qkv = jnp.dot(x, wqkv[...], preferred_element_type=jnp.float32) + bqkv[...]
        q = qkv[:, 0:hidden]
        k = qkv[:, hidden:2 * hidden]
        v = qkv[:, 2 * hidden:3 * hidden]

        # per-(batch, head) scaled-dot-product attention, fully unrolled in-kernel
        ctx_rows = []
        for bb in range(batch):
            r0, r1 = bb * seq, (bb + 1) * seq
            bias_b = bias[bb:bb + 1, :]                            # (1, S)
            head_outs = []
            for hh in range(heads):
                c0, c1 = hh * dh, (hh + 1) * dh
                qh = q[r0:r1, c0:c1]                               # (S, dh)
                kh = k[r0:r1, c0:c1]
                vh = v[r0:r1, c0:c1]
                sc = jax.lax.dot_general(qh, kh, (((1,), (1,)), ((), ())),
                                         preferred_element_type=jnp.float32)
                sc = sc * scale + bias_b                           # (S, S)
                sc = sc - jnp.max(sc, axis=-1, keepdims=True)
                p = jnp.exp(sc)
                p = p / jnp.sum(p, axis=-1, keepdims=True)
                head_outs.append(
                    jnp.dot(p, vh, preferred_element_type=jnp.float32))
            ctx_rows.append(jnp.concatenate(head_outs, axis=1))    # (S, H)
        ctx = jnp.concatenate(ctx_rows, axis=0)                    # (rows, H)

        # output projection + residual + LayerNorm (fused epilogue)
        attn_out = jnp.dot(ctx, wo[...], preferred_element_type=jnp.float32) + bo[...]
        x = layer_norm(attn_out + x, g1[...], be1[...])

        # feed-forward + residual + LayerNorm (fused epilogue)
        inter = jnp.dot(x, wi[...], preferred_element_type=jnp.float32) + bint[...]
        # TODO(synk): HF BERT uses exact erf-GELU; tanh approximation kept here
        # for guaranteed Mosaic lowering.
        inter = jax.nn.gelu(inter, approximate=True)
        ff = jnp.dot(inter, wo2[...], preferred_element_type=jnp.float32) + bo2[...]
        x = layer_norm(ff + x, g2[...], be2[...])

    # --- pooler (tanh on CLS token) + classification head + sigmoid ---
    cls = jnp.concatenate([x[bb * seq:bb * seq + 1, :] for bb in range(batch)],
                          axis=0)                                  # (B, H)
    pooled = jnp.tanh(jnp.dot(cls, wp_ref[...], preferred_element_type=jnp.float32)
                      + bp_ref[...])
    logits = jnp.dot(pooled, wc_ref[...], preferred_element_type=jnp.float32) + bc_ref[...]
    o_ref[...] = jax.nn.sigmoid(logits)


# -----------------------------------------------------------------------------
# Synthetic "BERT" config, deterministic parameter init, forward wrapper
# -----------------------------------------------------------------------------
CFG = dict(vocab=100, max_pos=16, type_vocab=2, hidden=32, heads=4,
           layers=2, intermediate=64, num_labels=15)


def init_params(key, cfg):
    h, im = cfg["hidden"], cfg["intermediate"]

    def nrm(k, shape):
        return 0.02 * jax.random.normal(k, shape, jnp.float32)

    keys = iter(jax.random.split(key, 64))
    p = {
        "word_emb": nrm(next(keys), (cfg["vocab"], h)),
        "pos_emb": nrm(next(keys), (cfg["max_pos"], h)),
        "type_emb": nrm(next(keys), (cfg["type_vocab"], h)),
        "emb_ln_g": jnp.ones((1, h), jnp.float32),
        "emb_ln_b": jnp.zeros((1, h), jnp.float32),
        "pool_w": nrm(next(keys), (h, h)),
        "pool_b": jnp.zeros((1, h), jnp.float32),
        "cls_w": nrm(next(keys), (h, cfg["num_labels"])),
        "cls_b": jnp.zeros((1, cfg["num_labels"]), jnp.float32),
        "layers": [],
    }
    for _ in range(cfg["layers"]):
        wq = nrm(next(keys), (h, h))
        wk = nrm(next(keys), (h, h))
        wv = nrm(next(keys), (h, h))
        p["layers"].append({
            "wqkv": jnp.concatenate([wq, wk, wv], axis=1),          # (H, 3H)
            "bqkv": jnp.zeros((1, 3 * h), jnp.float32),
            "wo": nrm(next(keys), (h, h)), "bo": jnp.zeros((1, h), jnp.float32),
            "ln1_g": jnp.ones((1, h), jnp.float32),
            "ln1_b": jnp.zeros((1, h), jnp.float32),
            "wi": nrm(next(keys), (h, im)), "bi": jnp.zeros((1, im), jnp.float32),
            "wo2": nrm(next(keys), (im, h)), "bo2": jnp.zeros((1, h), jnp.float32),
            "ln2_g": jnp.ones((1, h), jnp.float32),
            "ln2_b": jnp.zeros((1, h), jnp.float32),
        })
    return p


def news_click_forward(params, input_ids, attention_mask, cfg):
    b, s = input_ids.shape

    flat_inputs = [
        input_ids.reshape(b * s, 1).astype(jnp.int32),
        attention_mask.astype(jnp.float32),
        params["word_emb"], params["pos_emb"], params["type_emb"],
        params["emb_ln_g"], params["emb_ln_b"],
    ]
    for lp in params["layers"]:
        flat_inputs += [lp["wqkv"], lp["bqkv"], lp["wo"], lp["bo"],
                        lp["ln1_g"], lp["ln1_b"], lp["wi"], lp["bi"],
                        lp["wo2"], lp["bo2"], lp["ln2_g"], lp["ln2_b"]]
    flat_inputs += [params["pool_w"], params["pool_b"],
                    params["cls_w"], params["cls_b"]]

    kernel = functools.partial(
        _news_click_kernel, batch=b, seq=s, hidden=cfg["hidden"],
        heads=cfg["heads"], layers=cfg["layers"])

    return pl.pallas_call(
        kernel,
        out_shape=jax.ShapeDtypeStruct((b, cfg["num_labels"]), jnp.float32),
        # All operands are a few KB each; explicit (generous) VMEM budget so the
        # same structure stays safe across v5e/v6e/v7x scoped-VMEM defaults.
        compiler_params=pltpu.CompilerParams(vmem_limit_bytes=16 * 1024 * 1024),
    )(*flat_inputs)


# -----------------------------------------------------------------------------
if __name__ == "__main__":
    key = jax.random.PRNGKey(0)
    k_param, k_ids = jax.random.split(key)

    B, S = 2, 8
    params = init_params(k_param, CFG)

    input_ids = jax.random.randint(k_ids, (B, S), 0, CFG["vocab"], dtype=jnp.int32)
    lengths = jnp.array([8, 5], dtype=jnp.int32)
    attention_mask = (jnp.arange(S)[None, :] < lengths[:, None]).astype(jnp.float32)

    probs = news_click_forward(params, input_ids, attention_mask, CFG)
    probs = jax.block_until_ready(probs)

    assert probs.shape == (B, CFG["num_labels"])
    assert bool(jnp.all((probs >= 0.0) & (probs <= 1.0)))
    print("KERNEL_OK")
</pallas_src>

<mosaic_0001>
module attributes {stable_mosaic.version = 11 : i64} {
  func.func @_news_click_kernel(%arg0: memref<16x1xi32, #tpu.memory_space<vmem>>, %arg1: memref<2x8xf32, #tpu.memory_space<vmem>>, %arg2: memref<100x32xf32, #tpu.memory_space<vmem>>, %arg3: memref<16x32xf32, #tpu.memory_space<vmem>>, %arg4: memref<2x32xf32, #tpu.memory_space<vmem>>, %arg5: memref<1x32xf32, #tpu.memory_space<vmem>>, %arg6: memref<1x32xf32, #tpu.memory_space<vmem>>, %arg7: memref<32x96xf32, #tpu.memory_space<vmem>>, %arg8: memref<1x96xf32, #tpu.memory_space<vmem>>, %arg9: memref<32x32xf32, #tpu.memory_space<vmem>>, %arg10: memref<1x32xf32, #tpu.memory_space<vmem>>, %arg11: memref<1x32xf32, #tpu.memory_space<vmem>>, %arg12: memref<1x32xf32, #tpu.memory_space<vmem>>, %arg13: memref<32x64xf32, #tpu.memory_space<vmem>>, %arg14: memref<1x64xf32, #tpu.memory_space<vmem>>, %arg15: memref<64x32xf32, #tpu.memory_space<vmem>>, %arg16: memref<1x32xf32, #tpu.memory_space<vmem>>, %arg17: memref<1x32xf32, #tpu.memory_space<vmem>>, %arg18: memref<1x32xf32, #tpu.memory_space<vmem>>, %arg19: memref<32x96xf32, #tpu.memory_space<vmem>>, %arg20: memref<1x96xf32, #tpu.memory_space<vmem>>, %arg21: memref<32x32xf32, #tpu.memory_space<vmem>>, %arg22: memref<1x32xf32, #tpu.memory_space<vmem>>, %arg23: memref<1x32xf32, #tpu.memory_space<vmem>>, %arg24: memref<1x32xf32, #tpu.memory_space<vmem>>, %arg25: memref<32x64xf32, #tpu.memory_space<vmem>>, %arg26: memref<1x64xf32, #tpu.memory_space<vmem>>, %arg27: memref<64x32xf32, #tpu.memory_space<vmem>>, %arg28: memref<1x32xf32, #tpu.memory_space<vmem>>, %arg29: memref<1x32xf32, #tpu.memory_space<vmem>>, %arg30: memref<1x32xf32, #tpu.memory_space<vmem>>, %arg31: memref<32x32xf32, #tpu.memory_space<vmem>>, %arg32: memref<1x32xf32, #tpu.memory_space<vmem>>, %arg33: memref<32x15xf32, #tpu.memory_space<vmem>>, %arg34: memref<1x15xf32, #tpu.memory_space<vmem>>, %arg35: memref<2x15xf32, #tpu.memory_space<vmem>>) attributes {dimension_semantics = [], scalar_prefetch = 0 : i64, scratch_operands = 0 : i64, tpu.core_type = #tpu.core_type<tc>} {
    %c0 = arith.constant 0 : index
    %c0_0 = arith.constant 0 : index
    %0 = vector.load %arg0[%c0, %c0_0] : memref<16x1xi32, #tpu.memory_space<vmem>>, vector<16x1xi32>
    %1 = tpu.iota {dimensions = array<i32: 1>} : vector<16x100xi32>
    %2 = vector.broadcast %0 : vector<16x1xi32> to vector<16x100xi32>
    %3 = arith.cmpi eq, %1, %2 : vector<16x100xi32>
    %4 = arith.extui %3 : vector<16x100xi1> to vector<16x100xi32>
    %5 = arith.sitofp %4 : vector<16x100xi32> to vector<16x100xf32>
    %c0_1 = arith.constant 0 : index
    %c0_2 = arith.constant 0 : index
    %6 = vector.load %arg2[%c0_1, %c0_2] : memref<100x32xf32, #tpu.memory_space<vmem>>, vector<100x32xf32>
    %cst = arith.constant dense<0.000000e+00> : vector<16x32xf32>
    %7 = tpu.matmul %5, %6, %cst {dimension_numbers = #tpu.dot_dimension_numbers<[1], [0], [0], [1], [0, 0, 1, 1], [], []>} : vector<16x100xf32>, vector<100x32xf32>, vector<16x32xf32> -> vector<16x32xf32>
    %c0_3 = arith.constant 0 : index
    %c0_4 = arith.constant 0 : index
    %8 = vector.load %arg3[%c0_3, %c0_4] : memref<16x32xf32, #tpu.memory_space<vmem>>, vector<8x32xf32>
    %9 = tpu.concatenate %8, %8 in 0 : vector<8x32xf32>, vector<8x32xf32> -> vector<16x32xf32>
    %10 = arith.addf %7, %9 : vector<16x32xf32>
    %c0_5 = arith.constant 0 : index
    %c0_6 = arith.constant 0 : index
    %11 = vector.load %arg4[%c0_5, %c0_6] : memref<2x32xf32, #tpu.memory_space<vmem>>, vector<1x32xf32>
    %12 = vector.broadcast %11 : vector<1x32xf32> to vector<16x32xf32>
    %13 = arith.addf %10, %12 : vector<16x32xf32>
    %c0_7 = arith.constant 0 : index
    %c0_8 = arith.constant 0 : index
    %14 = vector.load %arg5[%c0_7, %c0_8] : memref<1x32xf32, #tpu.memory_space<vmem>>, vector<1x32xf32>
    %c0_9 = arith.constant 0 : index
    %c0_10 = arith.constant 0 : index
    %15 = vector.load %arg6[%c0_9, %c0_10] : memref<1x32xf32, #tpu.memory_space<vmem>>, vector<1x32xf32>
    %cst_11 = arith.constant dense<0.000000e+00> : vector<16xf32>
    %16 = vector.multi_reduction <add>, %13, %cst_11 [1] : vector<16x32xf32> to vector<16xf32>
    %17 = vector.shape_cast %16 : vector<16xf32> to vector<16x1xf32>
    %cst_12 = arith.constant 3.200000e+01 : f32
    %18 = vector.broadcast %cst_12 : f32 to vector<16x1xf32>
    %19 = arith.divf %17, %18 : vector<16x1xf32>
    %20 = vector.broadcast %19 : vector<16x1xf32> to vector<16x32xf32>
    %21 = arith.subf %13, %20 : vector<16x32xf32>
    %22 = arith.mulf %21, %21 : vector<16x32xf32>
    %cst_13 = arith.constant dense<0.000000e+00> : vector<16xf32>
    %23 = vector.multi_reduction <add>, %22, %cst_13 [1] : vector<16x32xf32> to vector<16xf32>
    %24 = vector.shape_cast %23 : vector<16xf32> to vector<16x1xf32>
    %cst_14 = arith.constant 3.200000e+01 : f32
    %25 = vector.broadcast %cst_14 : f32 to vector<16x1xf32>
    %26 = arith.divf %24, %25 : vector<16x1xf32>
    %27 = vector.broadcast %19 : vector<16x1xf32> to vector<16x32xf32>
    %28 = arith.subf %13, %27 : vector<16x32xf32>
    %cst_15 = arith.constant 9.99999996E-13 : f32
    %29 = vector.broadcast %cst_15 : f32 to vector<16x1xf32>
    %30 = arith.addf %26, %29 : vector<16x1xf32>
    %31 = math.rsqrt %30 : vector<16x1xf32>
    %32 = vector.broadcast %31 : vector<16x1xf32> to vector<16x32xf32>
    %33 = arith.mulf %28, %32 : vector<16x32xf32>
    %34 = vector.broadcast %14 : vector<1x32xf32> to vector<16x32xf32>
    %35 = arith.mulf %33, %34 : vector<16x32xf32>
    %36 = vector.broadcast %15 : vector<1x32xf32> to vector<16x32xf32>
    %37 = arith.addf %35, %36 : vector<16x32xf32>
    %c0_16 = arith.constant 0 : index
    %c0_17 = arith.constant 0 : index
    %38 = vector.load %arg1[%c0_16, %c0_17] : memref<2x8xf32, #tpu.memory_space<vmem>>, vector<2x8xf32>
    %cst_18 = arith.constant 1.000000e+00 : f32
    %39 = vector.broadcast %cst_18 : f32 to vector<2x8xf32>
    %40 = arith.subf %39, %38 : vector<2x8xf32>
    %cst_19 = arith.constant -1.000000e+09 : f32
    %41 = vector.broadcast %cst_19 : f32 to vector<2x8xf32>
    %42 = arith.mulf %40, %41 : vector<2x8xf32>
    %c0_20 = arith.constant 0 : index
    %c0_21 = arith.constant 0 : index
    %43 = vector.load %arg7[%c0_20, %c0_21] : memref<32x96xf32, #tpu.memory_space<vmem>>, vector<32x96xf32>
    %cst_22 = arith.constant dense<0.000000e+00> : vector<16x96xf32>
    %44 = tpu.matmul %37, %43, %cst_22 {dimension_numbers = #tpu.dot_dimension_numbers<[1], [0], [0], [1], [0, 0, 1, 1], [], []>} : vector<16x32xf32>, vector<32x96xf32>, vector<16x96xf32> -> vector<16x96xf32>
    %c0_23 = arith.constant 0 : index
    %c0_24 = arith.constant 0 : index
    %45 = vector.load %arg8[%c0_23, %c0_24] : memref<1x96xf32, #tpu.memory_space<vmem>>, vector<1x96xf32>
    %46 = vector.broadcast %45 : vector<1x96xf32> to vector<16x96xf32>
    %47 = arith.addf %44, %46 : vector<16x96xf32>
    %48 = vector.extract_strided_slice %47 {offsets = [0, 0], sizes = [16, 32], strides = [1, 1]} : vector<16x96xf32> to vector<16x32xf32>
    %49 = vector.extract_strided_slice %47 {offsets = [0, 32], sizes = [16, 32], strides = [1, 1]} : vector<16x96xf32> to vector<16x32xf32>
    %50 = vector.extract_strided_slice %47 {offsets = [0, 64], sizes = [16, 32], strides = [1, 1]} : vector<16x96xf32> to vector<16x32xf32>
    %51 = vector.extract_strided_slice %42 {offsets = [0, 0], sizes = [1, 8], strides = [1, 1]} : vector<2x8xf32> to vector<1x8xf32>
    %52 = vector.extract_strided_slice %48 {offsets = [0, 0], sizes = [8, 8], strides = [1, 1]} : vector<16x32xf32> to vector<8x8xf32>
    %53 = vector.extract_strided_slice %49 {offsets = [0, 0], sizes = [8, 8], strides = [1, 1]} : vector<16x32xf32> to vector<8x8xf32>
    %54 = vector.extract_strided_slice %50 {offsets = [0, 0], sizes = [8, 8], strides = [1, 1]} : vector<16x32xf32> to vector<8x8xf32>
    %cst_25 = arith.constant dense<0.000000e+00> : vector<8x8xf32>
    %55 = tpu.matmul %52, %53, %cst_25 {dimension_numbers = #tpu.dot_dimension_numbers<[1], [1], [0], [0], [0, 0, 1, 0], [], []>} : vector<8x8xf32>, vector<8x8xf32>, vector<8x8xf32> -> vector<8x8xf32>
    %cst_26 = arith.constant 0.353553385 : f32
    %56 = vector.broadcast %cst_26 : f32 to vector<8x8xf32>
    %57 = arith.mulf %55, %56 : vector<8x8xf32>
    %58 = vector.broadcast %51 : vector<1x8xf32> to vector<8x8xf32>
    %59 = arith.addf %57, %58 : vector<8x8xf32>
    %cst_27 = arith.constant dense<0xFF800000> : vector<8xf32>
    %60 = vector.multi_reduction <maximumf>, %59, %cst_27 [1] : vector<8x8xf32> to vector<8xf32>
    %61 = vector.shape_cast %60 : vector<8xf32> to vector<8x1xf32>
    %62 = vector.broadcast %61 : vector<8x1xf32> to vector<8x8xf32>
    %63 = arith.subf %59, %62 : vector<8x8xf32>
    %64 = math.exp %63 : vector<8x8xf32>
    %cst_28 = arith.constant dense<0.000000e+00> : vector<8xf32>
    %65 = vector.multi_reduction <add>, %64, %cst_28 [1] : vector<8x8xf32> to vector<8xf32>
    %66 = vector.shape_cast %65 : vector<8xf32> to vector<8x1xf32>
    %67 = vector.broadcast %66 : vector<8x1xf32> to vector<8x8xf32>
    %68 = arith.divf %64, %67 : vector<8x8xf32>
    %cst_29 = arith.constant dense<0.000000e+00> : vector<8x8xf32>
    %69 = tpu.matmul %68, %54, %cst_29 {dimension_numbers = #tpu.dot_dimension_numbers<[1], [0], [0], [1], [0, 0, 1, 1], [], []>} : vector<8x8xf32>, vector<8x8xf32>, vector<8x8xf32> -> vector<8x8xf32>
    %70 = vector.extract_strided_slice %48 {offsets = [0, 8], sizes = [8, 8], strides = [1, 1]} : vector<16x32xf32> to vector<8x8xf32>
    %71 = vector.extract_strided_slice %49 {offsets = [0, 8], sizes = [8, 8], strides = [1, 1]} : vector<16x32xf32> to vector<8x8xf32>
    %72 = vector.extract_strided_slice %50 {offsets = [0, 8], sizes = [8, 8], strides = [1, 1]} : vector<16x32xf32> to vector<8x8xf32>
    %cst_30 = arith.constant dense<0.000000e+00> : vector<8x8xf32>
    %73 = tpu.matmul %70, %71, %cst_30 {dimension_numbers = #tpu.dot_dimension_numbers<[1], [1], [0], [0], [0, 0, 1, 0], [], []>} : vector<8x8xf32>, vector<8x8xf32>, vector<8x8xf32> -> vector<8x8xf32>
    %cst_31 = arith.constant 0.353553385 : f32
    %74 = vector.broadcast %cst_31 : f32 to vector<8x8xf32>
    %75 = arith.mulf %73, %74 : vector<8x8xf32>
    %76 = vector.broadcast %51 : vector<1x8xf32> to vector<8x8xf32>
    %77 = arith.addf %75, %76 : vector<8x8xf32>
    %cst_32 = arith.constant dense<0xFF800000> : vector<8xf32>
    %78 = vector.multi_reduction <maximumf>, %77, %cst_32 [1] : vector<8x8xf32> to vector<8xf32>
    %79 = vector.shape_cast %78 : vector<8xf32> to vector<8x1xf32>
    %80 = vector.broadcast %79 : vector<8x1xf32> to vector<8x8xf32>
    %81 = arith.subf %77, %80 : vector<8x8xf32>
    %82 = math.exp %81 : vector<8x8xf32>
    %cst_33 = arith.constant dense<0.000000e+00> : vector<8xf32>
    %83 = vector.multi_reduction <add>, %82, %cst_33 [1] : vector<8x8xf32> to vector<8xf32>
    %84 = vector.shape_cast %83 : vector<8xf32> to vector<8x1xf32>
    %85 = vector.broadcast %84 : vector<8x1xf32> to vector<8x8xf32>
    %86 = arith.divf %82, %85 : vector<8x8xf32>
    %cst_34 = arith.constant dense<0.000000e+00> : vector<8x8xf32>
    %87 = tpu.matmul %86, %72, %cst_34 {dimension_numbers = #tpu.dot_dimension_numbers<[1], [0], [0], [1], [0, 0, 1, 1], [], []>} : vector<8x8xf32>, vector<8x8xf32>, vector<8x8xf32> -> vector<8x8xf32>
    %88 = vector.extract_strided_slice %48 {offsets = [0, 16], sizes = [8, 8], strides = [1, 1]} : vector<16x32xf32> to vector<8x8xf32>
    %89 = vector.extract_strided_slice %49 {offsets = [0, 16], sizes = [8, 8], strides = [1, 1]} : vector<16x32xf32> to vector<8x8xf32>
    %90 = vector.extract_strided_slice %50 {offsets = [0, 16], sizes = [8, 8], strides = [1, 1]} : vector<16x32xf32> to vector<8x8xf32>
    %cst_35 = arith.constant dense<0.000000e+00> : vector<8x8xf32>
    %91 = tpu.matmul %88, %89, %cst_35 {dimension_numbers = #tpu.dot_dimension_numbers<[1], [1], [0], [0], [0, 0, 1, 0], [], []>} : vector<8x8xf32>, vector<8x8xf32>, vector<8x8xf32> -> vector<8x8xf32>
    %cst_36 = arith.constant 0.353553385 : f32
    %92 = vector.broadcast %cst_36 : f32 to vector<8x8xf32>
    %93 = arith.mulf %91, %92 : vector<8x8xf32>
    %94 = vector.broadcast %51 : vector<1x8xf32> to vector<8x8xf32>
    %95 = arith.addf %93, %94 : vector<8x8xf32>
    %cst_37 = arith.constant dense<0xFF800000> : vector<8xf32>
    %96 = vector.multi_reduction <maximumf>, %95, %cst_37 [1] : vector<8x8xf32> to vector<8xf32>
    %97 = vector.shape_cast %96 : vector<8xf32> to vector<8x1xf32>
    %98 = vector.broadcast %97 : vector<8x1xf32> to vector<8x8xf32>
    %99 = arith.subf %95, %98 : vector<8x8xf32>
    %100 = math.exp %99 : vector<8x8xf32>
    %cst_38 = arith.constant dense<0.000000e+00> : vector<8xf32>
    %101 = vector.multi_reduction <add>, %100, %cst_38 [1] : vector<8x8xf32> to vector<8xf32>
    %102 = vector.shape_cast %101 : vector<8xf32> to vector<8x1xf32>
    %103 = vector.broadcast %102 : vector<8x1xf32> to vector<8x8xf32>
    %104 = arith.divf %100, %103 : vector<8x8xf32>
    %cst_39 = arith.constant dense<0.000000e+00> : vector<8x8xf32>
    %105 = tpu.matmul %104, %90, %cst_39 {dimension_numbers = #tpu.dot_dimension_numbers<[1], [0], [0], [1], [0, 0, 1, 1], [], []>} : vector<8x8xf32>, vector<8x8xf32>, vector<8x8xf32> -> vector<8x8xf32>
    %106 = vector.extract_strided_slice %48 {offsets = [0, 24], sizes = [8, 8], strides = [1, 1]} : vector<16x32xf32> to vector<8x8xf32>
    %107 = vector.extract_strided_slice %49 {offsets = [0, 24], sizes = [8, 8], strides = [1, 1]} : vector<16x32xf32> to vector<8x8xf32>
    %108 = vector.extract_strided_slice %50 {offsets = [0, 24], sizes = [8, 8], strides = [1, 1]} : vector<16x32xf32> to vector<8x8xf32>
    %cst_40 = arith.constant dense<0.000000e+00> : vector<8x8xf32>
    %109 = tpu.matmul %106, %107, %cst_40 {dimension_numbers = #tpu.dot_dimension_numbers<[1], [1], [0], [0], [0, 0, 1, 0], [], []>} : vector<8x8xf32>, vector<8x8xf32>, vector<8x8xf32> -> vector<8x8xf32>
    %cst_41 = arith.constant 0.353553385 : f32
    %110 = vector.broadcast %cst_41 : f32 to vector<8x8xf32>
    %111 = arith.mulf %109, %110 : vector<8x8xf32>
    %112 = vector.broadcast %51 : vector<1x8xf32> to vector<8x8xf32>
    %113 = arith.addf %111, %112 : vector<8x8xf32>
    %cst_42 = arith.constant dense<0xFF800000> : vector<8xf32>
    %114 = vector.multi_reduction <maximumf>, %113, %cst_42 [1] : vector<8x8xf32> to vector<8xf32>
    %115 = vector.shape_cast %114 : vector<8xf32> to vector<8x1xf32>
    %116 = vector.broadcast %115 : vector<8x1xf32> to vector<8x8xf32>
    %117 = arith.subf %113, %116 : vector<8x8xf32>
    %118 = math.exp %117 : vector<8x8xf32>
    %cst_43 = arith.constant dense<0.000000e+00> : vector<8xf32>
    %119 = vector.multi_reduction <add>, %118, %cst_43 [1] : vector<8x8xf32> to vector<8xf32>
    %120 = vector.shape_cast %119 : vector<8xf32> to vector<8x1xf32>
    %121 = vector.broadcast %120 : vector<8x1xf32> to vector<8x8xf32>
    %122 = arith.divf %118, %121 : vector<8x8xf32>
    %cst_44 = arith.constant dense<0.000000e+00> : vector<8x8xf32>
    %123 = tpu.matmul %122, %108, %cst_44 {dimension_numbers = #tpu.dot_dimension_numbers<[1], [0], [0], [1], [0, 0, 1, 1], [], []>} : vector<8x8xf32>, vector<8x8xf32>, vector<8x8xf32> -> vector<8x8xf32>
    %124 = tpu.concatenate %69, %87, %105, %123 in 1 : vector<8x8xf32>, vector<8x8xf32>, vector<8x8xf32>, vector<8x8xf32> -> vector<8x32xf32>
    %125 = vector.extract_strided_slice %42 {offsets = [1, 0], sizes = [1, 8], strides = [1, 1]} : vector<2x8xf32> to vector<1x8xf32>
    %126 = vector.extract_strided_slice %48 {offsets = [8, 0], sizes = [8, 8], strides = [1, 1]} : vector<16x32xf32> to vector<8x8xf32>
    %127 = vector.extract_strided_slice %49 {offsets = [8, 0], sizes = [8, 8], strides = [1, 1]} : vector<16x32xf32> to vector<8x8xf32>
    %128 = vector.extract_strided_slice %50 {offsets = [8, 0], sizes = [8, 8], strides = [1, 1]} : vector<16x32xf32> to vector<8x8xf32>
    %cst_45 = arith.constant dense<0.000000e+00> : vector<8x8xf32>
    %129 = tpu.matmul %126, %127, %cst_45 {dimension_numbers = #tpu.dot_dimension_numbers<[1], [1], [0], [0], [0, 0, 1, 0], [], []>} : vector<8x8xf32>, vector<8x8xf32>, vector<8x8xf32> -> vector<8x8xf32>
    %cst_46 = arith.constant 0.353553385 : f32
    %130 = vector.broadcast %cst_46 : f32 to vector<8x8xf32>
    %131 = arith.mulf %129, %130 : vector<8x8xf32>
    %132 = vector.broadcast %125 : vector<1x8xf32> to vector<8x8xf32>
    %133 = arith.addf %131, %132 : vector<8x8xf32>
    %cst_47 = arith.constant dense<0xFF800000> : vector<8xf32>
    %134 = vector.multi_reduction <maximumf>, %133, %cst_47 [1] : vector<8x8xf32> to vector<8xf32>
    %135 = vector.shape_cast %134 : vector<8xf32> to vector<8x1xf32>
    %136 = vector.broadcast %135 : vector<8x1xf32> to vector<8x8xf32>
    %137 = arith.subf %133, %136 : vector<8x8xf32>
    %138 = math.exp %137 : vector<8x8xf32>
    %cst_48 = arith.constant dense<0.000000e+00> : vector<8xf32>
    %139 = vector.multi_reduction <add>, %138, %cst_48 [1] : vector<8x8xf32> to vector<8xf32>
    %140 = vector.shape_cast %139 : vector<8xf32> to vector<8x1xf32>
    %141 = vector.broadcast %140 : vector<8x1xf32> to vector<8x8xf32>
    %142 = arith.divf %138, %141 : vector<8x8xf32>
    %cst_49 = arith.constant dense<0.000000e+00> : vector<8x8xf32>
    %143 = tpu.matmul %142, %128, %cst_49 {dimension_numbers = #tpu.dot_dimension_numbers<[1], [0], [0], [1], [0, 0, 1, 1], [], []>} : vector<8x8xf32>, vector<8x8xf32>, vector<8x8xf32> -> vector<8x8xf32>
    %144 = vector.extract_strided_slice %48 {offsets = [8, 8], sizes = [8, 8], strides = [1, 1]} : vector<16x32xf32> to vector<8x8xf32>
    %145 = vector.extract_strided_slice %49 {offsets = [8, 8], sizes = [8, 8], strides = [1, 1]} : vector<16x32xf32> to vector<8x8xf32>
    %146 = vector.extract_strided_slice %50 {offsets = [8, 8], sizes = [8, 8], strides = [1, 1]} : vector<16x32xf32> to vector<8x8xf32>
    %cst_50 = arith.constant dense<0.000000e+00> : vector<8x8xf32>
    %147 = tpu.matmul %144, %145, %cst_50 {dimension_numbers = #tpu.dot_dimension_numbers<[1], [1], [0], [0], [0, 0, 1, 0], [], []>} : vector<8x8xf32>, vector<8x8xf32>, vector<8x8xf32> -> vector<8x8xf32>
    %cst_51 = arith.constant 0.353553385 : f32
    %148 = vector.broadcast %cst_51 : f32 to vector<8x8xf32>
    %149 = arith.mulf %147, %148 : vector<8x8xf32>
    %150 = vector.broadcast %125 : vector<1x8xf32> to vector<8x8xf32>
    %151 = arith.addf %149, %150 : vector<8x8xf32>
    %cst_52 = arith.constant dense<0xFF800000> : vector<8xf32>
    %152 = vector.multi_reduction <maximumf>, %151, %cst_52 [1] : vector<8x8xf32> to vector<8xf32>
    %153 = vector.shape_cast %152 : vector<8xf32> to vector<8x1xf32>
    %154 = vector.broadcast %153 : vector<8x1xf32> to vector<8x8xf32>
    %155 = arith.subf %151, %154 : vector<8x8xf32>
    %156 = math.exp %155 : vector<8x8xf32>
    %cst_53 = arith.constant dense<0.000000e+00> : vector<8xf32>
    %157 = vector.multi_reduction <add>, %156, %cst_53 [1] : vector<8x8xf32> to vector<8xf32>
    %158 = vector.shape_cast %157 : vector<8xf32> to vector<8x1xf32>
    %159 = vector.broadcast %158 : vector<8x1xf32> to vector<8x8xf32>
    %160 = arith.divf %156, %159 : vector<8x8xf32>
    %cst_54 = arith.constant dense<0.000000e+00> : vector<8x8xf32>
    %161 = tpu.matmul %160, %146, %cst_54 {dimension_numbers = #tpu.dot_dimension_numbers<[1], [0], [0], [1], [0, 0, 1, 1], [], []>} : vector<8x8xf32>, vector<8x8xf32>, vector<8x8xf32> -> vector<8x8xf32>
    %162 = vector.extract_strided_slice %48 {offsets = [8, 16], sizes = [8, 8], strides = [1, 1]} : vector<16x32xf32> to vector<8x8xf32>
    %163 = vector.extract_strided_slice %49 {offsets = [8, 16], sizes = [8, 8], strides = [1, 1]} : vector<16x32xf32> to vector<8x8xf32>
    %164 = vector.extract_strided_slice %50 {offsets = [8, 16], sizes = [8, 8], strides = [1, 1]} : vector<16x32xf32> to vector<8x8xf32>
    %cst_55 = arith.constant dense<0.000000e+00> : vector<8x8xf32>
    %165 = tpu.matmul %162, %163, %cst_55 {dimension_numbers = #tpu.dot_dimension_numbers<[1], [1], [0], [0], [0, 0, 1, 0], [], []>} : vector<8x8xf32>, vector<8x8xf32>, vector<8x8xf32> -> vector<8x8xf32>
    %cst_56 = arith.constant 0.353553385 : f32
    %166 = vector.broadcast %cst_56 : f32 to vector<8x8xf32>
    %167 = arith.mulf %165, %166 : vector<8x8xf32>
    %168 = vector.broadcast %125 : vector<1x8xf32> to vector<8x8xf32>
    %169 = arith.addf %167, %168 : vector<8x8xf32>
    %cst_57 = arith.constant dense<0xFF800000> : vector<8xf32>
    %170 = vector.multi_reduction <maximumf>, %169, %cst_57 [1] : vector<8x8xf32> to vector<8xf32>
    %171 = vector.shape_cast %170 : vector<8xf32> to vector<8x1xf32>
    %172 = vector.broadcast %171 : vector<8x1xf32> to vector<8x8xf32>
    %173 = arith.subf %169, %172 : vector<8x8xf32>
    %174 = math.exp %173 : vector<8x8xf32>
    %cst_58 = arith.constant dense<0.000000e+00> : vector<8xf32>
    %175 = vector.multi_reduction <add>, %174, %cst_58 [1] : vector<8x8xf32> to vector<8xf32>
    %176 = vector.shape_cast %175 : vector<8xf32> to vector<8x1xf32>
    %177 = vector.broadcast %176 : vector<8x1xf32> to vector<8x8xf32>
    %178 = arith.divf %174, %177 : vector<8x8xf32>
    %cst_59 = arith.constant dense<0.000000e+00> : vector<8x8xf32>
    %179 = tpu.matmul %178, %164, %cst_59 {dimension_numbers = #tpu.dot_dimension_numbers<[1], [0], [0], [1], [0, 0, 1, 1], [], []>} : vector<8x8xf32>, vector<8x8xf32>, vector<8x8xf32> -> vector<8x8xf32>
    %180 = vector.extract_strided_slice %48 {offsets = [8, 24], sizes = [8, 8], strides = [1, 1]} : vector<16x32xf32> to vector<8x8xf32>
    %181 = vector.extract_strided_slice %49 {offsets = [8, 24], sizes = [8, 8], strides = [1, 1]} : vector<16x32xf32> to vector<8x8xf32>
    %182 = vector.extract_strided_slice %50 {offsets = [8, 24], sizes = [8, 8], strides = [1, 1]} : vector<16x32xf32> to vector<8x8xf32>
    %cst_60 = arith.constant dense<0.000000e+00> : vector<8x8xf32>
    %183 = tpu.matmul %180, %181, %cst_60 {dimension_numbers = #tpu.dot_dimension_numbers<[1], [1], [0], [0], [0, 0, 1, 0], [], []>} : vector<8x8xf32>, vector<8x8xf32>, vector<8x8xf32> -> vector<8x8xf32>
    %cst_61 = arith.constant 0.353553385 : f32
    %184 = vector.broadcast %cst_61 : f32 to vector<8x8xf32>
    %185 = arith.mulf %183, %184 : vector<8x8xf32>
    %186 = vector.broadcast %125 : vector<1x8xf32> to vector<8x8xf32>
    %187 = arith.addf %185, %186 : vector<8x8xf32>
    %cst_62 = arith.constant dense<0xFF800000> : vector<8xf32>
    %188 = vector.multi_reduction <maximumf>, %187, %cst_62 [1] : vector<8x8xf32> to vector<8xf32>
    %189 = vector.shape_cast %188 : vector<8xf32> to vector<8x1xf32>
    %190 = vector.broadcast %189 : vector<8x1xf32> to vector<8x8xf32>
    %191 = arith.subf %187, %190 : vector<8x8xf32>
    %192 = math.exp %191 : vector<8x8xf32>
    %cst_63 = arith.constant dense<0.000000e+00> : vector<8xf32>
    %193 = vector.multi_reduction <add>, %192, %cst_63 [1] : vector<8x8xf32> to vector<8xf32>
    %194 = vector.shape_cast %193 : vector<8xf32> to vector<8x1xf32>
    %195 = vector.broadcast %194 : vector<8x1xf32> to vector<8x8xf32>
    %196 = arith.divf %192, %195 : vector<8x8xf32>
    %cst_64 = arith.constant dense<0.000000e+00> : vector<8x8xf32>
    %197 = tpu.matmul %196, %182, %cst_64 {dimension_numbers = #tpu.dot_dimension_numbers<[1], [0], [0], [1], [0, 0, 1, 1], [], []>} : vector<8x8xf32>, vector<8x8xf32>, vector<8x8xf32> -> vector<8x8xf32>
    %198 = tpu.concatenate %143, %161, %179, %197 in 1 : vector<8x8xf32>, vector<8x8xf32>, vector<8x8xf32>, vector<8x8xf32> -> vector<8x32xf32>
    %199 = tpu.concatenate %124, %198 in 0 : vector<8x32xf32>, vector<8x32xf32> -> vector<16x32xf32>
    %c0_65 = arith.constant 0 : index
    %c0_66 = arith.constant 0 : index
    %200 = vector.load %arg9[%c0_65, %c0_66] : memref<32x32xf32, #tpu.memory_space<vmem>>, vector<32x32xf32>
    %cst_67 = arith.constant dense<0.000000e+00> : vector<16x32xf32>
    %201 = tpu.matmul %199, %200, %cst_67 {dimension_numbers = #tpu.dot_dimension_numbers<[1], [0], [0], [1], [0, 0, 1, 1], [], []>} : vector<16x32xf32>, vector<32x32xf32>, vector<16x32xf32> -> vector<16x32xf32>
    %c0_68 = arith.constant 0 : index
    %c0_69 = arith.constant 0 : index
    %202 = vector.load %arg10[%c0_68, %c0_69] : memref<1x32xf32, #tpu.memory_space<vmem>>, vector<1x32xf32>
    %203 = vector.broadcast %202 : vector<1x32xf32> to vector<16x32xf32>
    %204 = arith.addf %201, %203 : vector<16x32xf32>
    %205 = arith.addf %204, %37 : vector<16x32xf32>
    %c0_70 = arith.constant 0 : index
    %c0_71 = arith.constant 0 : index
    %206 = vector.load %arg11[%c0_70, %c0_71] : memref<1x32xf32, #tpu.memory_space<vmem>>, vector<1x32xf32>
    %c0_72 = arith.constant 0 : index
    %c0_73 = arith.constant 0 : index
    %207 = vector.load %arg12[%c0_72, %c0_73] : memref<1x32xf32, #tpu.memory_space<vmem>>, vector<1x32xf32>
    %cst_74 = arith.constant dense<0.000000e+00> : vector<16xf32>
    %208 = vector.multi_reduction <add>, %205, %cst_74 [1] : vector<16x32xf32> to vector<16xf32>
    %209 = vector.shape_cast %208 : vector<16xf32> to vector<16x1xf32>
    %cst_75 = arith.constant 3.200000e+01 : f32
    %210 = vector.broadcast %cst_75 : f32 to vector<16x1xf32>
    %211 = arith.divf %209, %210 : vector<16x1xf32>
    %212 = vector.broadcast %211 : vector<16x1xf32> to vector<16x32xf32>
    %213 = arith.subf %205, %212 : vector<16x32xf32>
    %214 = arith.mulf %213, %213 : vector<16x32xf32>
    %cst_76 = arith.constant dense<0.000000e+00> : vector<16xf32>
    %215 = vector.multi_reduction <add>, %214, %cst_76 [1] : vector<16x32xf32> to vector<16xf32>
    %216 = vector.shape_cast %215 : vector<16xf32> to vector<16x1xf32>
    %cst_77 = arith.constant 3.200000e+01 : f32
    %217 = vector.broadcast %cst_77 : f32 to vector<16x1xf32>
    %218 = arith.divf %216, %217 : vector<16x1xf32>
    %219 = vector.broadcast %211 : vector<16x1xf32> to vector<16x32xf32>
    %220 = arith.subf %205, %219 : vector<16x32xf32>
    %cst_78 = arith.constant 9.99999996E-13 : f32
    %221 = vector.broadcast %cst_78 : f32 to vector<16x1xf32>
    %222 = arith.addf %218, %221 : vector<16x1xf32>
    %223 = math.rsqrt %222 : vector<16x1xf32>
    %224 = vector.broadcast %223 : vector<16x1xf32> to vector<16x32xf32>
    %225 = arith.mulf %220, %224 : vector<16x32xf32>
    %226 = vector.broadcast %206 : vector<1x32xf32> to vector<16x32xf32>
    %227 = arith.mulf %225, %226 : vector<16x32xf32>
    %228 = vector.broadcast %207 : vector<1x32xf32> to vector<16x32xf32>
    %229 = arith.addf %227, %228 : vector<16x32xf32>
    %c0_79 = arith.constant 0 : index
    %c0_80 = arith.constant 0 : index
    %230 = vector.load %arg13[%c0_79, %c0_80] : memref<32x64xf32, #tpu.memory_space<vmem>>, vector<32x64xf32>
    %cst_81 = arith.constant dense<0.000000e+00> : vector<16x64xf32>
    %231 = tpu.matmul %229, %230, %cst_81 {dimension_numbers = #tpu.dot_dimension_numbers<[1], [0], [0], [1], [0, 0, 1, 1], [], []>} : vector<16x32xf32>, vector<32x64xf32>, vector<16x64xf32> -> vector<16x64xf32>
    %c0_82 = arith.constant 0 : index
    %c0_83 = arith.constant 0 : index
    %232 = vector.load %arg14[%c0_82, %c0_83] : memref<1x64xf32, #tpu.memory_space<vmem>>, vector<1x64xf32>
    %233 = vector.broadcast %232 : vector<1x64xf32> to vector<16x64xf32>
    %234 = arith.addf %231, %233 : vector<16x64xf32>
    %235 = arith.mulf %234, %234 : vector<16x64xf32>
    %236 = arith.mulf %234, %235 : vector<16x64xf32>
    %cst_84 = arith.constant 4.471500e-02 : f32
    %237 = vector.broadcast %cst_84 : f32 to vector<16x64xf32>
    %238 = arith.mulf %237, %236 : vector<16x64xf32>
    %239 = arith.addf %234, %238 : vector<16x64xf32>
    %cst_85 = arith.constant 0.797884583 : f32
    %240 = vector.broadcast %cst_85 : f32 to vector<16x64xf32>
    %241 = arith.mulf %240, %239 : vector<16x64xf32>
    %242 = math.tanh %241 : vector<16x64xf32>
    %cst_86 = arith.constant 1.000000e+00 : f32
    %243 = vector.broadcast %cst_86 : f32 to vector<16x64xf32>
    %244 = arith.addf %243, %242 : vector<16x64xf32>
    %cst_87 = arith.constant 5.000000e-01 : f32
    %245 = vector.broadcast %cst_87 : f32 to vector<16x64xf32>
    %246 = arith.mulf %245, %244 : vector<16x64xf32>
    %247 = arith.mulf %234, %246 : vector<16x64xf32>
    %c0_88 = arith.constant 0 : index
    %c0_89 = arith.constant 0 : index
    %248 = vector.load %arg15[%c0_88, %c0_89] : memref<64x32xf32, #tpu.memory_space<vmem>>, vector<64x32xf32>
    %cst_90 = arith.constant dense<0.000000e+00> : vector<16x32xf32>
    %249 = tpu.matmul %247, %248, %cst_90 {dimension_numbers = #tpu.dot_dimension_numbers<[1], [0], [0], [1], [0, 0, 1, 1], [], []>} : vector<16x64xf32>, vector<64x32xf32>, vector<16x32xf32> -> vector<16x32xf32>
    %c0_91 = arith.constant 0 : index
    %c0_92 = arith.constant 0 : index
    %250 = vector.load %arg16[%c0_91, %c0_92] : memref<1x32xf32, #tpu.memory_space<vmem>>, vector<1x32xf32>
    %251 = vector.broadcast %250 : vector<1x32xf32> to vector<16x32xf32>
    %252 = arith.addf %249, %251 : vector<16x32xf32>
    %253 = arith.addf %252, %229 : vector<16x32xf32>
    %c0_93 = arith.constant 0 : index
    %c0_94 = arith.constant 0 : index
    %254 = vector.load %arg17[%c0_93, %c0_94] : memref<1x32xf32, #tpu.memory_space<vmem>>, vector<1x32xf32>
    %c0_95 = arith.constant 0 : index
    %c0_96 = arith.constant 0 : index
    %255 = vector.load %arg18[%c0_95, %c0_96] : memref<1x32xf32, #tpu.memory_space<vmem>>, vector<1x32xf32>
    %cst_97 = arith.constant dense<0.000000e+00> : vector<16xf32>
    %256 = vector.multi_reduction <add>, %253, %cst_97 [1] : vector<16x32xf32> to vector<16xf32>
    %257 = vector.shape_cast %256 : vector<16xf32> to vector<16x1xf32>
    %cst_98 = arith.constant 3.200000e+01 : f32
    %258 = vector.broadcast %cst_98 : f32 to vector<16x1xf32>
    %259 = arith.divf %257, %258 : vector<16x1xf32>
    %260 = vector.broadcast %259 : vector<16x1xf32> to vector<16x32xf32>
    %261 = arith.subf %253, %260 : vector<16x32xf32>
    %262 = arith.mulf %261, %261 : vector<16x32xf32>
    %cst_99 = arith.constant dense<0.000000e+00> : vector<16xf32>
    %263 = vector.multi_reduction <add>, %262, %cst_99 [1] : vector<16x32xf32> to vector<16xf32>
    %264 = vector.shape_cast %263 : vector<16xf32> to vector<16x1xf32>
    %cst_100 = arith.constant 3.200000e+01 : f32
    %265 = vector.broadcast %cst_100 : f32 to vector<16x1xf32>
    %266 = arith.divf %264, %265 : vector<16x1xf32>
    %267 = vector.broadcast %259 : vector<16x1xf32> to vector<16x32xf32>
    %268 = arith.subf %253, %267 : vector<16x32xf32>
    %cst_101 = arith.constant 9.99999996E-13 : f32
    %269 = vector.broadcast %cst_101 : f32 to vector<16x1xf32>
    %270 = arith.addf %266, %269 : vector<16x1xf32>
    %271 = math.rsqrt %270 : vector<16x1xf32>
    %272 = vector.broadcast %271 : vector<16x1xf32> to vector<16x32xf32>
    %273 = arith.mulf %268, %272 : vector<16x32xf32>
    %274 = vector.broadcast %254 : vector<1x32xf32> to vector<16x32xf32>
    %275 = arith.mulf %273, %274 : vector<16x32xf32>
    %276 = vector.broadcast %255 : vector<1x32xf32> to vector<16x32xf32>
    %277 = arith.addf %275, %276 : vector<16x32xf32>
    %c0_102 = arith.constant 0 : index
    %c0_103 = arith.constant 0 : index
    %278 = vector.load %arg19[%c0_102, %c0_103] : memref<32x96xf32, #tpu.memory_space<vmem>>, vector<32x96xf32>
    %cst_104 = arith.constant dense<0.000000e+00> : vector<16x96xf32>
    %279 = tpu.matmul %277, %278, %cst_104 {dimension_numbers = #tpu.dot_dimension_numbers<[1], [0], [0], [1], [0, 0, 1, 1], [], []>} : vector<16x32xf32>, vector<32x96xf32>, vector<16x96xf32> -> vector<16x96xf32>
    %c0_105 = arith.constant 0 : index
    %c0_106 = arith.constant 0 : index
    %280 = vector.load %arg20[%c0_105, %c0_106] : memref<1x96xf32, #tpu.memory_space<vmem>>, vector<1x96xf32>
    %281 = vector.broadcast %280 : vector<1x96xf32> to vector<16x96xf32>
    %282 = arith.addf %279, %281 : vector<16x96xf32>
    %283 = vector.extract_strided_slice %282 {offsets = [0, 0], sizes = [16, 32], strides = [1, 1]} : vector<16x96xf32> to vector<16x32xf32>
    %284 = vector.extract_strided_slice %282 {offsets = [0, 32], sizes = [16, 32], strides = [1, 1]} : vector<16x96xf32> to vector<16x32xf32>
    %285 = vector.extract_strided_slice %282 {offsets = [0, 64], sizes = [16, 32], strides = [1, 1]} : vector<16x96xf32> to vector<16x32xf32>
    %286 = vector.extract_strided_slice %42 {offsets = [0, 0], sizes = [1, 8], strides = [1, 1]} : vector<2x8xf32> to vector<1x8xf32>
    %287 = vector.extract_strided_slice %283 {offsets = [0, 0], sizes = [8, 8], strides = [1, 1]} : vector<16x32xf32> to vector<8x8xf32>
    %288 = vector.extract_strided_slice %284 {offsets = [0, 0], sizes = [8, 8], strides = [1, 1]} : vector<16x32xf32> to vector<8x8xf32>
    %289 = vector.extract_strided_slice %285 {offsets = [0, 0], sizes = [8, 8], strides = [1, 1]} : vector<16x32xf32> to vector<8x8xf32>
    %cst_107 = arith.constant dense<0.000000e+00> : vector<8x8xf32>
    %290 = tpu.matmul %287, %288, %cst_107 {dimension_numbers = #tpu.dot_dimension_numbers<[1], [1], [0], [0], [0, 0, 1, 0], [], []>} : vector<8x8xf32>, vector<8x8xf32>, vector<8x8xf32> -> vector<8x8xf32>
    %cst_108 = arith.constant 0.353553385 : f32
    %291 = vector.broadcast %cst_108 : f32 to vector<8x8xf32>
    %292 = arith.mulf %290, %291 : vector<8x8xf32>
    %293 = vector.broadcast %286 : vector<1x8xf32> to vector<8x8xf32>
    %294 = arith.addf %292, %293 : vector<8x8xf32>
    %cst_109 = arith.constant dense<0xFF800000> : vector<8xf32>
    %295 = vector.multi_reduction <maximumf>, %294, %cst_109 [1] : vector<8x8xf32> to vector<8xf32>
    %296 = vector.shape_cast %295 : vector<8xf32> to vector<8x1xf32>
    %297 = vector.broadcast %296 : vector<8x1xf32> to vector<8x8xf32>
    %298 = arith.subf %294, %297 : vector<8x8xf32>
    %299 = math.exp %298 : vector<8x8xf32>
    %cst_110 = arith.constant dense<0.000000e+00> : vector<8xf32>
    %300 = vector.multi_reduction <add>, %299, %cst_110 [1] : vector<8x8xf32> to vector<8xf32>
    %301 = vector.shape_cast %300 : vector<8xf32> to vector<8x1xf32>
    %302 = vector.broadcast %301 : vector<8x1xf32> to vector<8x8xf32>
    %303 = arith.divf %299, %302 : vector<8x8xf32>
    %cst_111 = arith.constant dense<0.000000e+00> : vector<8x8xf32>
    %304 = tpu.matmul %303, %289, %cst_111 {dimension_numbers = #tpu.dot_dimension_numbers<[1], [0], [0], [1], [0, 0, 1, 1], [], []>} : vector<8x8xf32>, vector<8x8xf32>, vector<8x8xf32> -> vector<8x8xf32>
    %305 = vector.extract_strided_slice %283 {offsets = [0, 8], sizes = [8, 8], strides = [1, 1]} : vector<16x32xf32> to vector<8x8xf32>
    %306 = vector.extract_strided_slice %284 {offsets = [0, 8], sizes = [8, 8], strides = [1, 1]} : vector<16x32xf32> to vector<8x8xf32>
    %307 = vector.extract_strided_slice %285 {offsets = [0, 8], sizes = [8, 8], strides = [1, 1]} : vector<16x32xf32> to vector<8x8xf32>
    %cst_112 = arith.constant dense<0.000000e+00> : vector<8x8xf32>
    %308 = tpu.matmul %305, %306, %cst_112 {dimension_numbers = #tpu.dot_dimension_numbers<[1], [1], [0], [0], [0, 0, 1, 0], [], []>} : vector<8x8xf32>, vector<8x8xf32>, vector<8x8xf32> -> vector<8x8xf32>
    %cst_113 = arith.constant 0.353553385 : f32
    %309 = vector.broadcast %cst_113 : f32 to vector<8x8xf32>
    %310 = arith.mulf %308, %309 : vector<8x8xf32>
    %311 = vector.broadcast %286 : vector<1x8xf32> to vector<8x8xf32>
    %312 = arith.addf %310, %311 : vector<8x8xf32>
    %cst_114 = arith.constant dense<0xFF800000> : vector<8xf32>
    %313 = vector.multi_reduction <maximumf>, %312, %cst_114 [1] : vector<8x8xf32> to vector<8xf32>
    %314 = vector.shape_cast %313 : vector<8xf32> to vector<8x1xf32>
    %315 = vector.broadcast %314 : vector<8x1xf32> to vector<8x8xf32>
    %316 = arith.subf %312, %315 : vector<8x8xf32>
    %317 = math.exp %316 : vector<8x8xf32>
    %cst_115 = arith.constant dense<0.000000e+00> : vector<8xf32>
    %318 = vector.multi_reduction <add>, %317, %cst_115 [1] : vector<8x8xf32> to vector<8xf32>
    %319 = vector.shape_cast %318 : vector<8xf32> to vector<8x1xf32>
    %320 = vector.broadcast %319 : vector<8x1xf32> to vector<8x8xf32>
    %321 = arith.divf %317, %320 : vector<8x8xf32>
    %cst_116 = arith.constant dense<0.000000e+00> : vector<8x8xf32>
    %322 = tpu.matmul %321, %307, %cst_116 {dimension_numbers = #tpu.dot_dimension_numbers<[1], [0], [0], [1], [0, 0, 1, 1], [], []>} : vector<8x8xf32>, vector<8x8xf32>, vector<8x8xf32> -> vector<8x8xf32>
    %323 = vector.extract_strided_slice %283 {offsets = [0, 16], sizes = [8, 8], strides = [1, 1]} : vector<16x32xf32> to vector<8x8xf32>
    %324 = vector.extract_strided_slice %284 {offsets = [0, 16], sizes = [8, 8], strides = [1, 1]} : vector<16x32xf32> to vector<8x8xf32>
    %325 = vector.extract_strided_slice %285 {offsets = [0, 16], sizes = [8, 8], strides = [1, 1]} : vector<16x32xf32> to vector<8x8xf32>
    %cst_117 = arith.constant dense<0.000000e+00> : vector<8x8xf32>
    %326 = tpu.matmul %323, %324, %cst_117 {dimension_numbers = #tpu.dot_dimension_numbers<[1], [1], [0], [0], [0, 0, 1, 0], [], []>} : vector<8x8xf32>, vector<8x8xf32>, vector<8x8xf32> -> vector<8x8xf32>
    %cst_118 = arith.constant 0.353553385 : f32
    %327 = vector.broadcast %cst_118 : f32 to vector<8x8xf32>
    %328 = arith.mulf %326, %327 : vector<8x8xf32>
    %329 = vector.broadcast %286 : vector<1x8xf32> to vector<8x8xf32>
    %330 = arith.addf %328, %329 : vector<8x8xf32>
    %cst_119 = arith.constant dense<0xFF800000> : vector<8xf32>
    %331 = vector.multi_reduction <maximumf>, %330, %cst_119 [1] : vector<8x8xf32> to vector<8xf32>
    %332 = vector.shape_cast %331 : vector<8xf32> to vector<8x1xf32>
    %333 = vector.broadcast %332 : vector<8x1xf32> to vector<8x8xf32>
    %334 = arith.subf %330, %333 : vector<8x8xf32>
    %335 = math.exp %334 : vector<8x8xf32>
    %cst_120 = arith.constant dense<0.000000e+00> : vector<8xf32>
    %336 = vector.multi_reduction <add>, %335, %cst_120 [1] : vector<8x8xf32> to vector<8xf32>
    %337 = vector.shape_cast %336 : vector<8xf32> to vector<8x1xf32>
    %338 = vector.broadcast %337 : vector<8x1xf32> to vector<8x8xf32>
    %339 = arith.divf %335, %338 : vector<8x8xf32>
    %cst_121 = arith.constant dense<0.000000e+00> : vector<8x8xf32>
    %340 = tpu.matmul %339, %325, %cst_121 {dimension_numbers = #tpu.dot_dimension_numbers<[1], [0], [0], [1], [0, 0, 1, 1], [], []>} : vector<8x8xf32>, vector<8x8xf32>, vector<8x8xf32> -> vector<8x8xf32>
    %341 = vector.extract_strided_slice %283 {offsets = [0, 24], sizes = [8, 8], strides = [1, 1]} : vector<16x32xf32> to vector<8x8xf32>
    %342 = vector.extract_strided_slice %284 {offsets = [0, 24], sizes = [8, 8], strides = [1, 1]} : vector<16x32xf32> to vector<8x8xf32>
    %343 = vector.extract_strided_slice %285 {offsets = [0, 24], sizes = [8, 8], strides = [1, 1]} : vector<16x32xf32> to vector<8x8xf32>
    %cst_122 = arith.constant dense<0.000000e+00> : vector<8x8xf32>
    %344 = tpu.matmul %341, %342, %cst_122 {dimension_numbers = #tpu.dot_dimension_numbers<[1], [1], [0], [0], [0, 0, 1, 0], [], []>} : vector<8x8xf32>, vector<8x8xf32>, vector<8x8xf32> -> vector<8x8xf32>
    %cst_123 = arith.constant 0.353553385 : f32
    %345 = vector.broadcast %cst_123 : f32 to vector<8x8xf32>
    %346 = arith.mulf %344, %345 : vector<8x8xf32>
    %347 = vector.broadcast %286 : vector<1x8xf32> to vector<8x8xf32>
    %348 = arith.addf %346, %347 : vector<8x8xf32>
    %cst_124 = arith.constant dense<0xFF800000> : vector<8xf32>
    %349 = vector.multi_reduction <maximumf>, %348, %cst_124 [1] : vector<8x8xf32> to vector<8xf32>
    %350 = vector.shape_cast %349 : vector<8xf32> to vector<8x1xf32>
    %351 = vector.broadcast %350 : vector<8x1xf32> to vector<8x8xf32>
    %352 = arith.subf %348, %351 : vector<8x8xf32>
    %353 = math.exp %352 : vector<8x8xf32>
    %cst_125 = arith.constant dense<0.000000e+00> : vector<8xf32>
    %354 = vector.multi_reduction <add>, %353, %cst_125 [1] : vector<8x8xf32> to vector<8xf32>
    %355 = vector.shape_cast %354 : vector<8xf32> to vector<8x1xf32>
    %356 = vector.broadcast %355 : vector<8x1xf32> to vector<8x8xf32>
    %357 = arith.divf %353, %356 : vector<8x8xf32>
    %cst_126 = arith.constant dense<0.000000e+00> : vector<8x8xf32>
    %358 = tpu.matmul %357, %343, %cst_126 {dimension_numbers = #tpu.dot_dimension_numbers<[1], [0], [0], [1], [0, 0, 1, 1], [], []>} : vector<8x8xf32>, vector<8x8xf32>, vector<8x8xf32> -> vector<8x8xf32>
    %359 = tpu.concatenate %304, %322, %340, %358 in 1 : vector<8x8xf32>, vector<8x8xf32>, vector<8x8xf32>, vector<8x8xf32> -> vector<8x32xf32>
    %360 = vector.extract_strided_slice %42 {offsets = [1, 0], sizes = [1, 8], strides = [1, 1]} : vector<2x8xf32> to vector<1x8xf32>
    %361 = vector.extract_strided_slice %283 {offsets = [8, 0], sizes = [8, 8], strides = [1, 1]} : vector<16x32xf32> to vector<8x8xf32>
    %362 = vector.extract_strided_slice %284 {offsets = [8, 0], sizes = [8, 8], strides = [1, 1]} : vector<16x32xf32> to vector<8x8xf32>
    %363 = vector.extract_strided_slice %285 {offsets = [8, 0], sizes = [8, 8], strides = [1, 1]} : vector<16x32xf32> to vector<8x8xf32>
    %cst_127 = arith.constant dense<0.000000e+00> : vector<8x8xf32>
    %364 = tpu.matmul %361, %362, %cst_127 {dimension_numbers = #tpu.dot_dimension_numbers<[1], [1], [0], [0], [0, 0, 1, 0], [], []>} : vector<8x8xf32>, vector<8x8xf32>, vector<8x8xf32> -> vector<8x8xf32>
    %cst_128 = arith.constant 0.353553385 : f32
    %365 = vector.broadcast %cst_128 : f32 to vector<8x8xf32>
    %366 = arith.mulf %364, %365 : vector<8x8xf32>
    %367 = vector.broadcast %360 : vector<1x8xf32> to vector<8x8xf32>
    %368 = arith.addf %366, %367 : vector<8x8xf32>
    %cst_129 = arith.constant dense<0xFF800000> : vector<8xf32>
    %369 = vector.multi_reduction <maximumf>, %368, %cst_129 [1] : vector<8x8xf32> to vector<8xf32>
    %370 = vector.shape_cast %369 : vector<8xf32> to vector<8x1xf32>
    %371 = vector.broadcast %370 : vector<8x1xf32> to vector<8x8xf32>
    %372 = arith.subf %368, %371 : vector<8x8xf32>
    %373 = math.exp %372 : vector<8x8xf32>
    %cst_130 = arith.constant dense<0.000000e+00> : vector<8xf32>
    %374 = vector.multi_reduction <add>, %373, %cst_130 [1] : vector<8x8xf32> to vector<8xf32>
    %375 = vector.shape_cast %374 : vector<8xf32> to vector<8x1xf32>
    %376 = vector.broadcast %375 : vector<8x1xf32> to vector<8x8xf32>
    %377 = arith.divf %373, %376 : vector<8x8xf32>
    %cst_131 = arith.constant dense<0.000000e+00> : vector<8x8xf32>
    %378 = tpu.matmul %377, %363, %cst_131 {dimension_numbers = #tpu.dot_dimension_numbers<[1], [0], [0], [1], [0, 0, 1, 1], [], []>} : vector<8x8xf32>, vector<8x8xf32>, vector<8x8xf32> -> vector<8x8xf32>
    %379 = vector.extract_strided_slice %283 {offsets = [8, 8], sizes = [8, 8], strides = [1, 1]} : vector<16x32xf32> to vector<8x8xf32>
    %380 = vector.extract_strided_slice %284 {offsets = [8, 8], sizes = [8, 8], strides = [1, 1]} : vector<16x32xf32> to vector<8x8xf32>
    %381 = vector.extract_strided_slice %285 {offsets = [8, 8], sizes = [8, 8], strides = [1, 1]} : vector<16x32xf32> to vector<8x8xf32>
    %cst_132 = arith.constant dense<0.000000e+00> : vector<8x8xf32>
    %382 = tpu.matmul %379, %380, %cst_132 {dimension_numbers = #tpu.dot_dimension_numbers<[1], [1], [0], [0], [0, 0, 1, 0], [], []>} : vector<8x8xf32>, vector<8x8xf32>, vector<8x8xf32> -> vector<8x8xf32>
    %cst_133 = arith.constant 0.353553385 : f32
    %383 = vector.broadcast %cst_133 : f32 to vector<8x8xf32>
    %384 = arith.mulf %382, %383 : vector<8x8xf32>
    %385 = vector.broadcast %360 : vector<1x8xf32> to vector<8x8xf32>
    %386 = arith.addf %384, %385 : vector<8x8xf32>
    %cst_134 = arith.constant dense<0xFF800000> : vector<8xf32>
    %387 = vector.multi_reduction <maximumf>, %386, %cst_134 [1] : vector<8x8xf32> to vector<8xf32>
    %388 = vector.shape_cast %387 : vector<8xf32> to vector<8x1xf32>
    %389 = vector.broadcast %388 : vector<8x1xf32> to vector<8x8xf32>
    %390 = arith.subf %386, %389 : vector<8x8xf32>
    %391 = math.exp %390 : vector<8x8xf32>
    %cst_135 = arith.constant dense<0.000000e+00> : vector<8xf32>
    %392 = vector.multi_reduction <add>, %391, %cst_135 [1] : vector<8x8xf32> to vector<8xf32>
    %393 = vector.shape_cast %392 : vector<8xf32> to vector<8x1xf32>
    %394 = vector.broadcast %393 : vector<8x1xf32> to vector<8x8xf32>
    %395 = arith.divf %391, %394 : vector<8x8xf32>
    %cst_136 = arith.constant dense<0.000000e+00> : vector<8x8xf32>
    %396 = tpu.matmul %395, %381, %cst_136 {dimension_numbers = #tpu.dot_dimension_numbers<[1], [0], [0], [1], [0, 0, 1, 1], [], []>} : vector<8x8xf32>, vector<8x8xf32>, vector<8x8xf32> -> vector<8x8xf32>
    %397 = vector.extract_strided_slice %283 {offsets = [8, 16], sizes = [8, 8], strides = [1, 1]} : vector<16x32xf32> to vector<8x8xf32>
    %398 = vector.extract_strided_slice %284 {offsets = [8, 16], sizes = [8, 8], strides = [1, 1]} : vector<16x32xf32> to vector<8x8xf32>
    %399 = vector.extract_strided_slice %285 {offsets = [8, 16], sizes = [8, 8], strides = [1, 1]} : vector<16x32xf32> to vector<8x8xf32>
    %cst_137 = arith.constant dense<0.000000e+00> : vector<8x8xf32>
    %400 = tpu.matmul %397, %398, %cst_137 {dimension_numbers = #tpu.dot_dimension_numbers<[1], [1], [0], [0], [0, 0, 1, 0], [], []>} : vector<8x8xf32>, vector<8x8xf32>, vector<8x8xf32> -> vector<8x8xf32>
    %cst_138 = arith.constant 0.353553385 : f32
    %401 = vector.broadcast %cst_138 : f32 to vector<8x8xf32>
    %402 = arith.mulf %400, %401 : vector<8x8xf32>
    %403 = vector.broadcast %360 : vector<1x8xf32> to vector<8x8xf32>
    %404 = arith.addf %402, %403 : vector<8x8xf32>
    %cst_139 = arith.constant dense<0xFF800000> : vector<8xf32>
    %405 = vector.multi_reduction <maximumf>, %404, %cst_139 [1] : vector<8x8xf32> to vector<8xf32>
    %406 = vector.shape_cast %405 : vector<8xf32> to vector<8x1xf32>
    %407 = vector.broadcast %406 : vector<8x1xf32> to vector<8x8xf32>
    %408 = arith.subf %404, %407 : vector<8x8xf32>
    %409 = math.exp %408 : vector<8x8xf32>
    %cst_140 = arith.constant dense<0.000000e+00> : vector<8xf32>
    %410 = vector.multi_reduction <add>, %409, %cst_140 [1] : vector<8x8xf32> to vector<8xf32>
    %411 = vector.shape_cast %410 : vector<8xf32> to vector<8x1xf32>
    %412 = vector.broadcast %411 : vector<8x1xf32> to vector<8x8xf32>
    %413 = arith.divf %409, %412 : vector<8x8xf32>
    %cst_141 = arith.constant dense<0.000000e+00> : vector<8x8xf32>
    %414 = tpu.matmul %413, %399, %cst_141 {dimension_numbers = #tpu.dot_dimension_numbers<[1], [0], [0], [1], [0, 0, 1, 1], [], []>} : vector<8x8xf32>, vector<8x8xf32>, vector<8x8xf32> -> vector<8x8xf32>
    %415 = vector.extract_strided_slice %283 {offsets = [8, 24], sizes = [8, 8], strides = [1, 1]} : vector<16x32xf32> to vector<8x8xf32>
    %416 = vector.extract_strided_slice %284 {offsets = [8, 24], sizes = [8, 8], strides = [1, 1]} : vector<16x32xf32> to vector<8x8xf32>
    %417 = vector.extract_strided_slice %285 {offsets = [8, 24], sizes = [8, 8], strides = [1, 1]} : vector<16x32xf32> to vector<8x8xf32>
    %cst_142 = arith.constant dense<0.000000e+00> : vector<8x8xf32>
    %418 = tpu.matmul %415, %416, %cst_142 {dimension_numbers = #tpu.dot_dimension_numbers<[1], [1], [0], [0], [0, 0, 1, 0], [], []>} : vector<8x8xf32>, vector<8x8xf32>, vector<8x8xf32> -> vector<8x8xf32>
    %cst_143 = arith.constant 0.353553385 : f32
    %419 = vector.broadcast %cst_143 : f32 to vector<8x8xf32>
    %420 = arith.mulf %418, %419 : vector<8x8xf32>
    %421 = vector.broadcast %360 : vector<1x8xf32> to vector<8x8xf32>
    %422 = arith.addf %420, %421 : vector<8x8xf32>
    %cst_144 = arith.constant dense<0xFF800000> : vector<8xf32>
    %423 = vector.multi_reduction <maximumf>, %422, %cst_144 [1] : vector<8x8xf32> to vector<8xf32>
    %424 = vector.shape_cast %423 : vector<8xf32> to vector<8x1xf32>
    %425 = vector.broadcast %424 : vector<8x1xf32> to vector<8x8xf32>
    %426 = arith.subf %422, %425 : vector<8x8xf32>
    %427 = math.exp %426 : vector<8x8xf32>
    %cst_145 = arith.constant dense<0.000000e+00> : vector<8xf32>
    %428 = vector.multi_reduction <add>, %427, %cst_145 [1] : vector<8x8xf32> to vector<8xf32>
    %429 = vector.shape_cast %428 : vector<8xf32> to vector<8x1xf32>
    %430 = vector.broadcast %429 : vector<8x1xf32> to vector<8x8xf32>
    %431 = arith.divf %427, %430 : vector<8x8xf32>
    %cst_146 = arith.constant dense<0.000000e+00> : vector<8x8xf32>
    %432 = tpu.matmul %431, %417, %cst_146 {dimension_numbers = #tpu.dot_dimension_numbers<[1], [0], [0], [1], [0, 0, 1, 1], [], []>} : vector<8x8xf32>, vector<8x8xf32>, vector<8x8xf32> -> vector<8x8xf32>
    %433 = tpu.concatenate %378, %396, %414, %432 in 1 : vector<8x8xf32>, vector<8x8xf32>, vector<8x8xf32>, vector<8x8xf32> -> vector<8x32xf32>
    %434 = tpu.concatenate %359, %433 in 0 : vector<8x32xf32>, vector<8x32xf32> -> vector<16x32xf32>
    %c0_147 = arith.constant 0 : index
    %c0_148 = arith.constant 0 : index
    %435 = vector.load %arg21[%c0_147, %c0_148] : memref<32x32xf32, #tpu.memory_space<vmem>>, vector<32x32xf32>
    %cst_149 = arith.constant dense<0.000000e+00> : vector<16x32xf32>
    %436 = tpu.matmul %434, %435, %cst_149 {dimension_numbers = #tpu.dot_dimension_numbers<[1], [0], [0], [1], [0, 0, 1, 1], [], []>} : vector<16x32xf32>, vector<32x32xf32>, vector<16x32xf32> -> vector<16x32xf32>
    %c0_150 = arith.constant 0 : index
    %c0_151 = arith.constant 0 : index
    %437 = vector.load %arg22[%c0_150, %c0_151] : memref<1x32xf32, #tpu.memory_space<vmem>>, vector<1x32xf32>
    %438 = vector.broadcast %437 : vector<1x32xf32> to vector<16x32xf32>
    %439 = arith.addf %436, %438 : vector<16x32xf32>
    %440 = arith.addf %439, %277 : vector<16x32xf32>
    %c0_152 = arith.constant 0 : index
    %c0_153 = arith.constant 0 : index
    %441 = vector.load %arg23[%c0_152, %c0_153] : memref<1x32xf32, #tpu.memory_space<vmem>>, vector<1x32xf32>
    %c0_154 = arith.constant 0 : index
    %c0_155 = arith.constant 0 : index
    %442 = vector.load %arg24[%c0_154, %c0_155] : memref<1x32xf32, #tpu.memory_space<vmem>>, vector<1x32xf32>
    %cst_156 = arith.constant dense<0.000000e+00> : vector<16xf32>
    %443 = vector.multi_reduction <add>, %440, %cst_156 [1] : vector<16x32xf32> to vector<16xf32>
    %444 = vector.shape_cast %443 : vector<16xf32> to vector<16x1xf32>
    %cst_157 = arith.constant 3.200000e+01 : f32
    %445 = vector.broadcast %cst_157 : f32 to vector<16x1xf32>
    %446 = arith.divf %444, %445 : vector<16x1xf32>
    %447 = vector.broadcast %446 : vector<16x1xf32> to vector<16x32xf32>
    %448 = arith.subf %440, %447 : vector<16x32xf32>
    %449 = arith.mulf %448, %448 : vector<16x32xf32>
    %cst_158 = arith.constant dense<0.000000e+00> : vector<16xf32>
    %450 = vector.multi_reduction <add>, %449, %cst_158 [1] : vector<16x32xf32> to vector<16xf32>
    %451 = vector.shape_cast %450 : vector<16xf32> to vector<16x1xf32>
    %cst_159 = arith.constant 3.200000e+01 : f32
    %452 = vector.broadcast %cst_159 : f32 to vector<16x1xf32>
    %453 = arith.divf %451, %452 : vector<16x1xf32>
    %454 = vector.broadcast %446 : vector<16x1xf32> to vector<16x32xf32>
    %455 = arith.subf %440, %454 : vector<16x32xf32>
    %cst_160 = arith.constant 9.99999996E-13 : f32
    %456 = vector.broadcast %cst_160 : f32 to vector<16x1xf32>
    %457 = arith.addf %453, %456 : vector<16x1xf32>
    %458 = math.rsqrt %457 : vector<16x1xf32>
    %459 = vector.broadcast %458 : vector<16x1xf32> to vector<16x32xf32>
    %460 = arith.mulf %455, %459 : vector<16x32xf32>
    %461 = vector.broadcast %441 : vector<1x32xf32> to vector<16x32xf32>
    %462 = arith.mulf %460, %461 : vector<16x32xf32>
    %463 = vector.broadcast %442 : vector<1x32xf32> to vector<16x32xf32>
    %464 = arith.addf %462, %463 : vector<16x32xf32>
    %c0_161 = arith.constant 0 : index
    %c0_162 = arith.constant 0 : index
    %465 = vector.load %arg25[%c0_161, %c0_162] : memref<32x64xf32, #tpu.memory_space<vmem>>, vector<32x64xf32>
    %cst_163 = arith.constant dense<0.000000e+00> : vector<16x64xf32>
    %466 = tpu.matmul %464, %465, %cst_163 {dimension_numbers = #tpu.dot_dimension_numbers<[1], [0], [0], [1], [0, 0, 1, 1], [], []>} : vector<16x32xf32>, vector<32x64xf32>, vector<16x64xf32> -> vector<16x64xf32>
    %c0_164 = arith.constant 0 : index
    %c0_165 = arith.constant 0 : index
    %467 = vector.load %arg26[%c0_164, %c0_165] : memref<1x64xf32, #tpu.memory_space<vmem>>, vector<1x64xf32>
    %468 = vector.broadcast %467 : vector<1x64xf32> to vector<16x64xf32>
    %469 = arith.addf %466, %468 : vector<16x64xf32>
    %470 = arith.mulf %469, %469 : vector<16x64xf32>
    %471 = arith.mulf %469, %470 : vector<16x64xf32>
    %cst_166 = arith.constant 4.471500e-02 : f32
    %472 = vector.broadcast %cst_166 : f32 to vector<16x64xf32>
    %473 = arith.mulf %472, %471 : vector<16x64xf32>
    %474 = arith.addf %469, %473 : vector<16x64xf32>
    %cst_167 = arith.constant 0.797884583 : f32
    %475 = vector.broadcast %cst_167 : f32 to vector<16x64xf32>
    %476 = arith.mulf %475, %474 : vector<16x64xf32>
    %477 = math.tanh %476 : vector<16x64xf32>
    %cst_168 = arith.constant 1.000000e+00 : f32
    %478 = vector.broadcast %cst_168 : f32 to vector<16x64xf32>
    %479 = arith.addf %478, %477 : vector<16x64xf32>
    %cst_169 = arith.constant 5.000000e-01 : f32
    %480 = vector.broadcast %cst_169 : f32 to vector<16x64xf32>
    %481 = arith.mulf %480, %479 : vector<16x64xf32>
    %482 = arith.mulf %469, %481 : vector<16x64xf32>
    %c0_170 = arith.constant 0 : index
    %c0_171 = arith.constant 0 : index
    %483 = vector.load %arg27[%c0_170, %c0_171] : memref<64x32xf32, #tpu.memory_space<vmem>>, vector<64x32xf32>
    %cst_172 = arith.constant dense<0.000000e+00> : vector<16x32xf32>
    %484 = tpu.matmul %482, %483, %cst_172 {dimension_numbers = #tpu.dot_dimension_numbers<[1], [0], [0], [1], [0, 0, 1, 1], [], []>} : vector<16x64xf32>, vector<64x32xf32>, vector<16x32xf32> -> vector<16x32xf32>
    %c0_173 = arith.constant 0 : index
    %c0_174 = arith.constant 0 : index
    %485 = vector.load %arg28[%c0_173, %c0_174] : memref<1x32xf32, #tpu.memory_space<vmem>>, vector<1x32xf32>
    %486 = vector.broadcast %485 : vector<1x32xf32> to vector<16x32xf32>
    %487 = arith.addf %484, %486 : vector<16x32xf32>
    %488 = arith.addf %487, %464 : vector<16x32xf32>
    %c0_175 = arith.constant 0 : index
    %c0_176 = arith.constant 0 : index
    %489 = vector.load %arg29[%c0_175, %c0_176] : memref<1x32xf32, #tpu.memory_space<vmem>>, vector<1x32xf32>
    %c0_177 = arith.constant 0 : index
    %c0_178 = arith.constant 0 : index
    %490 = vector.load %arg30[%c0_177, %c0_178] : memref<1x32xf32, #tpu.memory_space<vmem>>, vector<1x32xf32>
    %cst_179 = arith.constant dense<0.000000e+00> : vector<16xf32>
    %491 = vector.multi_reduction <add>, %488, %cst_179 [1] : vector<16x32xf32> to vector<16xf32>
    %492 = vector.shape_cast %491 : vector<16xf32> to vector<16x1xf32>
    %cst_180 = arith.constant 3.200000e+01 : f32
    %493 = vector.broadcast %cst_180 : f32 to vector<16x1xf32>
    %494 = arith.divf %492, %493 : vector<16x1xf32>
    %495 = vector.broadcast %494 : vector<16x1xf32> to vector<16x32xf32>
    %496 = arith.subf %488, %495 : vector<16x32xf32>
    %497 = arith.mulf %496, %496 : vector<16x32xf32>
    %cst_181 = arith.constant dense<0.000000e+00> : vector<16xf32>
    %498 = vector.multi_reduction <add>, %497, %cst_181 [1] : vector<16x32xf32> to vector<16xf32>
    %499 = vector.shape_cast %498 : vector<16xf32> to vector<16x1xf32>
    %cst_182 = arith.constant 3.200000e+01 : f32
    %500 = vector.broadcast %cst_182 : f32 to vector<16x1xf32>
    %501 = arith.divf %499, %500 : vector<16x1xf32>
    %502 = vector.broadcast %494 : vector<16x1xf32> to vector<16x32xf32>
    %503 = arith.subf %488, %502 : vector<16x32xf32>
    %cst_183 = arith.constant 9.99999996E-13 : f32
    %504 = vector.broadcast %cst_183 : f32 to vector<16x1xf32>
    %505 = arith.addf %501, %504 : vector<16x1xf32>
    %506 = math.rsqrt %505 : vector<16x1xf32>
    %507 = vector.broadcast %506 : vector<16x1xf32> to vector<16x32xf32>
    %508 = arith.mulf %503, %507 : vector<16x32xf32>
    %509 = vector.broadcast %489 : vector<1x32xf32> to vector<16x32xf32>
    %510 = arith.mulf %508, %509 : vector<16x32xf32>
    %511 = vector.broadcast %490 : vector<1x32xf32> to vector<16x32xf32>
    %512 = arith.addf %510, %511 : vector<16x32xf32>
    %513 = vector.extract_strided_slice %512 {offsets = [0, 0], sizes = [1, 32], strides = [1, 1]} : vector<16x32xf32> to vector<1x32xf32>
    %514 = vector.extract_strided_slice %512 {offsets = [8, 0], sizes = [1, 32], strides = [1, 1]} : vector<16x32xf32> to vector<1x32xf32>
    %515 = tpu.concatenate %513, %514 in 0 : vector<1x32xf32>, vector<1x32xf32> -> vector<2x32xf32>
    %c0_184 = arith.constant 0 : index
    %c0_185 = arith.constant 0 : index
    %516 = vector.load %arg31[%c0_184, %c0_185] : memref<32x32xf32, #tpu.memory_space<vmem>>, vector<32x32xf32>
    %cst_186 = arith.constant dense<0.000000e+00> : vector<2x32xf32>
    %517 = tpu.matmul %515, %516, %cst_186 {dimension_numbers = #tpu.dot_dimension_numbers<[1], [0], [0], [1], [0, 0, 1, 1], [], []>} : vector<2x32xf32>, vector<32x32xf32>, vector<2x32xf32> -> vector<2x32xf32>
    %c0_187 = arith.constant 0 : index
    %c0_188 = arith.constant 0 : index
    %518 = vector.load %arg32[%c0_187, %c0_188] : memref<1x32xf32, #tpu.memory_space<vmem>>, vector<1x32xf32>
    %519 = vector.broadcast %518 : vector<1x32xf32> to vector<2x32xf32>
    %520 = arith.addf %517, %519 : vector<2x32xf32>
    %521 = math.tanh %520 : vector<2x32xf32>
    %c0_189 = arith.constant 0 : index
    %c0_190 = arith.constant 0 : index
    %522 = vector.load %arg33[%c0_189, %c0_190] : memref<32x15xf32, #tpu.memory_space<vmem>>, vector<32x15xf32>
    %cst_191 = arith.constant dense<0.000000e+00> : vector<2x15xf32>
    %523 = tpu.matmul %521, %522, %cst_191 {dimension_numbers = #tpu.dot_dimension_numbers<[1], [0], [0], [1], [0, 0, 1, 1], [], []>} : vector<2x32xf32>, vector<32x15xf32>, vector<2x15xf32> -> vector<2x15xf32>
    %c0_192 = arith.constant 0 : index
    %c0_193 = arith.constant 0 : index
    %524 = vector.load %arg34[%c0_192, %c0_193] : memref<1x15xf32, #tpu.memory_space<vmem>>, vector<1x15xf32>
    %525 = vector.broadcast %524 : vector<1x15xf32> to vector<2x15xf32>
    %526 = arith.addf %523, %525 : vector<2x15xf32>
    %527 = arith.negf %526 : vector<2x15xf32>
    %528 = math.exp %527 : vector<2x15xf32>
    %cst_194 = arith.constant 1.000000e+00 : f32
    %529 = vector.broadcast %cst_194 : f32 to vector<2x15xf32>
    %530 = arith.addf %529, %528 : vector<2x15xf32>
    %531 = arith.divf %529, %530 : vector<2x15xf32>
    %c0_195 = arith.constant 0 : index
    %c0_196 = arith.constant 0 : index
    %532 = vector.load %arg35[%c0_195, %c0_196] : memref<2x15xf32, #tpu.memory_space<vmem>>, vector<2x15xf32>
    tpu.vector_store %arg35[%c0_195, %c0_196], %531 {strides = array<i32>} : memref<2x15xf32, #tpu.memory_space<vmem>>, vector<2x15xf32>,
    return
  }
}

</mosaic_0001>

<bundles_post_ra>
// kernel: tpu_custom_call.1
= control target key start
LH: loop header
LB: loop body
LE: loop exit
PB: predicated region body
PF: predicated region fallthrough
CT: control target
= control target key end

     0   :  { %s4981_s6 = smov 1   ;;  %s4982_s10 = smov 2   ;;  %s5736_s0 = inlined_call_operand.smem [shape: u32[36], index: -1, kind: input, shape index: {}] }
   0x1   :  { %s5042_s5 = sld [smem:[%s5736_s0]]   ;;  %s4983_s14 = smov 3  }
   0x2   :  { %s5047_s9 = sld [smem:[%s5736_s0 + %s4981_s6]]   ;;  %s4984_s18 = smov 4  }
   0x3   :  { %s5052_s13 = sld [smem:[%s5736_s0 + %s4982_s10]]   ;;  %s4985_s22 = smov 5  }
   0x4   :  { %s5057_s17 = sld [smem:[%s5736_s0 + %s4983_s14]]   ;;  %s4986_s26 = smov 6  }
   0x5   :  { %s5062_s21 = sld [smem:[%s5736_s0 + %s4984_s18]]   ;;  %s4987_s30 = smov 7  }
   0x6   :  { %s5067_s25 = sld [smem:[%s5736_s0 + %s4985_s22]]   ;;  %s4988_s4 = smov 8  }
   0x7   :  { %s5072_s29 = sld [smem:[%s5736_s0 + %s4986_s26]]   ;;  %s4989_s10 = smov 9  }
   0x8   :  { %s5077_s3 = sld [smem:[%s5736_s0 + %s4987_s30]]   ;;  %s4990_s15 = smov 10  }
   0x9   :  { %s5082_s8 = sld [smem:[%s5736_s0 + %s4988_s4]]   ;;  %s4991_s20 = smov 11  }
   0xa   :  { %s5087_s14 = sld [smem:[%s5736_s0 + %s4989_s10]]   ;;  %s4992_s26 = smov 12  }
   0xb   :  { %s5092_s19 = sld [smem:[%s5736_s0 + %s4990_s15]]   ;;  %s4993_s1 = smov 13  }
   0xc   :  { %s5097_s24 = sld [smem:[%s5736_s0 + %s4991_s20]]   ;;  %s4994_s7 = smov 14  }
   0xd   :  { %s5102_s30 = sld [smem:[%s5736_s0 + %s4992_s26]]   ;;  %s4995_s15 = smov 15  }
   0xe   :  { %s5107_s6 = sld [smem:[%s5736_s0 + %s4993_s1]]   ;;  %s4996_s22 = smov 16  }
   0xf   :  { %s5112_s12 = sld [smem:[%s5736_s0 + %s4994_s7]]   ;;  %s4997_s28 = smov 17  }
  0x10   :  { %s5117_s20 = sld [smem:[%s5736_s0 + %s4995_s15]]   ;;  %s4998_s7 = smov 18  }
  0x11   :  { %s5122_s27 = sld [smem:[%s5736_s0 + %s4996_s22]]   ;;  %s4999_s15 = smov 19  }
  0x12   :  { %s5127_s4 = sld [smem:[%s5736_s0 + %s4997_s28]]   ;;  %s5000_s22 = smov 20  }
  0x13   :  { %s5001_s28 = smov 21  }
  0x15   :  { %5743 = sst [smem:[#allocation5_spill]] %s5112_s12 }
  0x16   :  { %5744 = sst [smem:[#allocation6_spill]] %s5117_s20 }
  0x17   :  { %5745 = sst [smem:[#allocation7_spill]] %s5122_s27 }
  0x18   :  { %5746 = sst [smem:[#allocation8_spill]] %s5127_s4 }
  0x19   :  { %s5132_s12 = sld [smem:[%s5736_s0 + %s4998_s7]]   ;;  %s5002_s7 = smov 22  }
  0x1a   :  { %s5137_s20 = sld [smem:[%s5736_s0 + %s4999_s15]]   ;;  %s5003_s15 = smov 23  }
  0x1b   :  { %s5142_s27 = sld [smem:[%s5736_s0 + %s5000_s22]]   ;;  %s5004_s22 = smov 24  }
  0x1c   :  { %s5147_s4 = sld [smem:[%s5736_s0 + %s5001_s28]]   ;;  %s5005_s28 = smov 25  }
  0x1f   :  { %5747 = sst [smem:[#allocation9_spill]] %s5132_s12 }
  0x20   :  { %5748 = sst [smem:[#allocation10_spill]] %s5137_s20 }
  0x21   :  { %5749 = sst [smem:[#allocation11_spill]] %s5142_s27 }
  0x22   :  { %5750 = sst [smem:[#allocation12_spill]] %s5147_s4 }
  0x23   :  { %s5152_s12 = sld [smem:[%s5736_s0 + %s5002_s7]]   ;;  %s5006_s7 = smov 26  }
  0x24   :  { %s5157_s20 = sld [smem:[%s5736_s0 + %s5003_s15]]   ;;  %s5007_s15 = smov 27  }
  0x25   :  { %s5162_s27 = sld [smem:[%s5736_s0 + %s5004_s22]]   ;;  %s5008_s22 = smov 28  }
  0x26   :  { %s5167_s4 = sld [smem:[%s5736_s0 + %s5005_s28]]   ;;  %s5009_s28 = smov 29  }
  0x29   :  { %5751 = sst [smem:[#allocation13_spill]] %s5152_s12 }
  0x2a   :  { %5752 = sst [smem:[#allocation14_spill]] %s5157_s20 }
  0x2b   :  { %5753 = sst [smem:[#allocation15_spill]] %s5162_s27 }
  0x2c   :  { %5754 = sst [smem:[#allocation16_spill]] %s5167_s4 }
  0x2d   :  { %s5172_s12 = sld [smem:[%s5736_s0 + %s5006_s7]]   ;;  %s5010_s7 = smov 30  }
  0x2e   :  { %s5177_s20 = sld [smem:[%s5736_s0 + %s5007_s15]]   ;;  %s5011_s15 = smov 31  }
  0x2f   :  { %s5182_s27 = sld [smem:[%s5736_s0 + %s5008_s22]]   ;;  %s5012_s22 = smov 32  }
  0x30   :  { %s5187_s4 = sld [smem:[%s5736_s0 + %s5009_s28]]   ;;  %s5013_s28 = smov 33  }
  0x33   :  { %5755 = sst [smem:[#allocation17_spill]] %s5172_s12 }
  0x34   :  { %5756 = sst [smem:[#allocation18_spill]] %s5177_s20 }
  0x35   :  { %5757 = sst [smem:[#allocation19_spill]] %s5182_s27 }
  0x36   :  { %5758 = sst [smem:[#allocation20_spill]] %s5187_s4 }
  0x37   :  { %s5192_s12 = sld [smem:[%s5736_s0 + %s5010_s7]]   ;;  %s5014_s7 = smov 34  }
  0x38   :  { %s5197_s20 = sld [smem:[%s5736_s0 + %s5011_s15]]   ;;  %s5015_s15 = smov 35  }
  0x39   :  { %s5202_s27 = sld [smem:[%s5736_s0 + %s5012_s22]]  }
  0x3a   :  { %s5207_s4 = sld [smem:[%s5736_s0 + %s5013_s28]]  }
  0x3d   :  { %5759 = sst [smem:[#allocation21_spill]] %s5192_s12 }
  0x3e   :  { %5760 = sst [smem:[#allocation22_spill]] %s5197_s20 }
  0x3f   :  { %s5212_s12 = sld [smem:[%s5736_s0 + %s5014_s7]]  }
  0x40   :  { %s5217_s20 = sld [smem:[%s5736_s0 + %s5015_s15]]  }
  0x41   :  { %v147_v0 = vld [vmem:[%s5042_s5] sm:$0xff]  ;;  %vm184_vm0 = vcmask 1043456   ;;  %v5016_v2 = vmov 0   ;;  %v174_v3 = vld [vmem:[%s5052_s13 + $0x58] sm:$0xff]  ;;  %v149_v4 = vlaneseq  ;;  %v173_v5 = vld [vmem:[%s5052_s13 + $0x50] sm:$0xff] }
  0x42   :  { %v175_v1 = vld [vmem:[%s5052_s13 + $0x60] sm:$0xf]  ;;  %4860 = vset.pattern.permute.xlu0 %v5016_v2  ;;  %v148_v6 = vld [vmem:[%s5042_s5 + $0x8] sm:$0xff] }
  0x43   :  { %4492 = vmatprep.subr.msk.mxu0 %vm184_vm0, %v175_v1  ;;  %152 = vperm.xlu0 %4860, %v147_v0   ;;  %v5224_v7 = vshrl.u32 %v149_v4, 7  ;;  %v172_v8 = vld [vmem:[%s5052_s13 + $0x48] sm:$0xff]  ;;  %v316_v9 = vld [vmem:[%s5047_s9] sm:$0x3] }
  0x44   :  { %4493 = vmatpush3.msk.msra.mxu0 %vm184_vm0, %v175_v1  ;;  %v317_v10 = vsub.f32 1.0, %v316_v9 }
  0x45   :  { %4494 = vmatprep.subr.mxu0 %v174_v3  ;;  %v1180_v11 = vsub.s32 1, %v5224_v7 }
  0x46   :  { %4495 = vmatpush3.msra.mxu0 %v174_v3 }
  0x47   :  { %4496 = vmatprep.subr.mxu0 %v173_v5 }
  0x48   :  { %76 = vsyncpa [#allocation3], 0  ;;  %155 = vperm.xlu0 %4860, %v148_v6   ;;  %4497 = vmatpush3.msra.mxu0 %v173_v5  ;;  %v171_v12 = vld [vmem:[%s5052_s13 + $0x40] sm:$0xff]  ;;  %v5230_v13 = vmul.f32 -1e+09, %v317_v10  ;;  %v170_v14 = vld [vmem:[%s5052_s13 + $0x38] sm:$0xff] }
  0x49   :  { %4498 = vmatprep.subr.mxu0 %v172_v8  ;;  %v169_v16 = vld [vmem:[%s5052_s13 + $0x30] sm:$0xff]  ;;  %v168_v17 = vld [vmem:[%s5052_s13 + $0x28] sm:$0xff]  ;;  %v167_v18 = vld [vmem:[%s5052_s13 + $0x20] sm:$0xff]  ;;  %v5017_v23 = vmov 0.0   ;;  %v150_v24 = vand.u32 127, %v149_v4  ;;  %vm177_vm1 = vcmask 818176  }
  0x4a   :  { %4499 = vmatpush3.msra.mxu0 %v172_v8  ;;  %v5234_v15 = vrot.slane %v5230_v13, %v1180_v11  ;;  %v166_v19 = vld [vmem:[%s5052_s13 + $0x18] sm:$0xff]  ;;  %v165_v20 = vld [vmem:[%s5052_s13 + $0x10] sm:$0xff]  ;;  %v164_v21 = vld [vmem:[%s5052_s13 + $0x8] sm:$0xff]  ;;  %vm272_vm4 = vcmask 261120   ;;  %vm5018_vm5 = vmmov 0   ;;  %s5019_s0 = smov 64  }
  0x4b   :  { %4500 = vmatprep.subr.mxu0 %v171_v12  ;;  %v163_v22 = vld [vmem:[%s5052_s13] sm:$0xff]  ;;  %v322_v49 = vld [vmem:[%s5077_s3 + $0x18] sm:$0xff]  ;;  %v321_v50 = vld [vmem:[%s5077_s3 + $0x10] sm:$0xff]  ;;  %s5020_s5 = smov 96   ;;  %vm414_vm6 = vcmask 64512   ;;  %s5021_s9 = smov 120  }
  0x4c   :  { %4501 = vmatpush3.msra.mxu0 %v171_v12  ;;  %v176_v30 = vld [vmem:[%s5057_s17] sm:$0xff]  ;;  %4521 = vmatprep.subr.mxu1 %v322_v49  ;;  %v320_v51 = vld [vmem:[%s5077_s3 + $0x8] sm:$0xff]  ;;  %s5022_s13 = smov 88   ;;  %s5023_s17 = smov 56   ;;  %vm1096_vm7 = vcmask 130048   ;;  %vm1098_vm8 = vcmask 195584  }
  0x4d   :  { %4502 = vmatprep.subr.mxu0 %v170_v14  ;;  %v4259_v34 = vld [vmem:[%s5062_s21] ss:$0 sm:$0xff]  ;;  %4522 = vmatpush3.msra.mxu1 %v322_v49  ;;  %s5024_s21 = smov 112   ;;  %s5029_s22 = smov 48   ;;  %vm2049_vm9 = vcmask 523264   ;;  %vm4026_vm10 = vcmask 1040384  }
  0x4e   :  { %4503 = vmatpush3.msra.mxu0 %v170_v14  ;;  %4523 = vmatprep.subr.mxu1 %v321_v50  ;;  %v319_v52 = vld [vmem:[%s5077_s3] sm:$0xff]  ;;  %v492_v14 = vsub.s32 0, %v5224_v7  ;;  %s5027_s3 = smov 80   ;;  %s5030_s23 = smov 8   ;;  %vm4203_vm11 = vcmask 115712  }
  0x4f   :  { %4504 = vmatprep.subr.mxu0 %v169_v16  ;;  %4524 = vmatpush3.msra.mxu1 %v321_v50  ;;  %v4260_v60 = vld [vmem:[%s5067_s25] ss:$0 sm:$0xff]  ;;  %s5025_s25 = smov 72   ;;  %s5031_s26 = smov 16  }
  0x50   :  { %4505 = vmatpush3.msra.mxu0 %v169_v16  ;;  %4525 = vmatprep.subr.mxu1 %v320_v51  ;;  %v4261_v62 = vld [vmem:[%s5072_s29] ss:$0 sm:$0xff]  ;;  %v5289_v16 = vrot.slane %v5230_v13, %v492_v14  ;;  %s5026_s29 = smov 104   ;;  %s5032_s28 = smov 24  }
  0x51   :  { %4506 = vmatprep.subr.mxu0 %v168_v17  ;;  %4526 = vmatpush3.msra.mxu1 %v320_v51  ;;  %v4262_v5 = vld [vmem:[%s5082_s8] ss:$0 sm:$0xff]  ;;  %s5028_s8 = smov 40   ;;  %s5766_s1 = sld [smem:[#allocation9_spill]] }
  0x52   :  { %4507 = vmatpush3.msra.mxu0 %v168_v17  ;;  %4527 = vmatprep.subr.mxu1 %v319_v52  ;;  %s5767_s2 = sld [smem:[#allocation11_spill]] }
  0x53   :  { %4508 = vmatprep.subr.mxu0 %v167_v18  ;;  %4528 = vmatpush3.msra.mxu1 %v319_v52  ;;  %s5768_s7 = sld [smem:[#allocation12_spill]] }
  0x54   :  { %4509 = vmatpush3.msra.mxu0 %v167_v18  ;;  %4532 = vmatprep.subr.mxu1 %v5017_v23  ;;  %s5769_s10 = sld [smem:[#allocation13_spill]] }
  0x55   :  { %4510 = vmatprep.subr.mxu0 %v166_v19  ;;  %s5770_s11 = sld [smem:[#allocation16_spill]] }
  0x56   :  { %4511 = vmatpush3.msra.mxu0 %v166_v19  ;;  %s5771_s15 = sld [smem:[#allocation14_spill]] }
  0x57   :  { %4512 = vmatprep.subr.mxu0 %v165_v20  ;;  %s5772_s16 = sld [smem:[#allocation15_spill]] }
  0x58   :  { %4513 = vmatpush3.msra.mxu0 %v165_v20  ;;  %s5773_s18 = sld [smem:[#allocation18_spill]] }
  0x59   :  { %4514 = vmatprep.subr.mxu0 %v164_v21 }
  0x5a   :  { %4515 = vmatpush3.msra.mxu0 %v164_v21 }
  0x5b   :  { %4516 = vmatprep.subr.mxu0 %v163_v22 }
  0x5c   :  { %4517 = vmatpush3.msra.mxu0 %v163_v22 }
  0x5d   :  { %4557 = vmatprep.subr.mxu0 %v5017_v23 }
  0xbe   :  { %v153_v25 = vpop.permute.xlu0 %152 }
  0xbf   :  { %vm157_vm2 = vcmp.eq.s32.totalorder %v150_v24, %v153_v25 }
  0xc0   :  { %v4254_v26 = vsel %vm157_vm2, 1.0, %v5017_v23 }
  0xc1   :  { %4518 = vmatprep.mubr.msk.f32.mxu0 %vm177_vm1, %v4254_v26 }
  0xc3   :  { %v156_v27 = vpop.permute.xlu0 %155 }
  0xc4   :  { %vm158_vm3 = vcmp.eq.s32.totalorder %v150_v24, %v156_v27 }
  0xc5   :  { %v4255_v28 = vsel %vm158_vm3, 1.0, %v5017_v23 }
  0xc6   :  { %4519 = vmatmul.mubr.msk.f32.vlgmr.msra.gmra.mxu0 %vm177_vm1, %v4255_v28 }
  0xc7   :  { %4559 = vmatprep.mubr.msk.f32.mxu0 %vm5018_vm5, %v5017_v23 }
 0x186   :  { %v4520_v29 = vpop.f32.mrf.mxu0 }
 0x187   :  { %v260_v32 = vadd.f32 %v4520_v29, %v176_v30 }
 0x188   :  { %v254_v31 = vpop.f32.mrf.mxu0 }
 0x189   :  { %v255_v33 = vadd.f32 %v254_v31, %v176_v30  ;;  %v269_v37 = vadd.f32 %v4259_v34, %v260_v32 }
 0x18b   :  { %v268_v35 = vadd.f32 %v4259_v34, %v255_v33  ;;  %v276_v38 = vsel %vm272_vm4, %v269_v37, 0.0 }
 0x18d   :  { %v273_v36 = vsel %vm272_vm4, %v268_v35, 0.0 }
 0x18e   :  { %274 = vadd.xlane.f32.xlu1 %v273_v36 }
 0x192   :  { %277 = vadd.xlane.f32.xlu1 %v276_v38 }
 0x217   :  { %v275_v39 = vpop.xlane.xlu1 %274 }
 0x218   :  { %v280_v40 = vmul.f32 0.03125, %v275_v39 }
 0x21a   :  { %v282_v41 = vsub.f32 %v268_v35, %v280_v40 }
 0x21b   :  { %v278_v42 = vpop.xlane.xlu1 %277 }
 0x21c   :  { %v281_v43 = vmul.f32 0.03125, %v278_v42  ;;  %v284_v44 = vmul.f32 %v282_v41, %v282_v41 }
 0x21e   :  { %v283_v45 = vsub.f32 %v269_v37, %v281_v43  ;;  %v286_v46 = vsel %vm272_vm4, %v284_v44, 0.0 }
 0x21f   :  { %287 = vadd.xlane.f32.xlu0 %v286_v46 }
 0x220   :  { %v285_v47 = vmul.f32 %v283_v45, %v283_v45 }
 0x222   :  { %v289_v48 = vsel %vm272_vm4, %v285_v47, 0.0 }
 0x223   :  { %290 = vadd.xlane.f32.xlu1 %v289_v48 }
 0x2a8   :  { %v288_v53 = vpop.xlane.xlu0 %287 }
 0x2a9   :  { %v292_v54 = vmul.f32 0.03125, %v288_v53 }
 0x2ab   :  { %v294_v55 = vadd.f32 1e-12, %v292_v54 }
 0x2ac   :  { %v291_v56 = vpop.xlane.xlu1 %290 }
 0x2ad   :  { %4861 = vrsqrt.f32 %v294_v55  ;;  %v293_v57 = vmul.f32 0.03125, %v291_v56 }
 0x2af   :  { %v295_v58 = vadd.f32 1e-12, %v293_v57 }
 0x2b1   :  { %4863 = vrsqrt.f32 %v295_v58 }
 0x2ba   :  { %v4862_v59 = vpop.eup %4861 }
 0x2bb   :  { %v298_v61 = vmul.f32 %v4862_v59, %v282_v41 }
 0x2bd   :  { %v306_v63 = vmul.f32 %v4260_v60, %v298_v61 }
 0x2be   :  { %v4864_v0 = vpop.eup %4863 }
 0x2bf   :  { %v299_v1 = vmul.f32 %v4864_v0, %v283_v45  ;;  %v5259_v2 = vadd.f32 %v4261_v62, %v306_v63 }
 0x2c1   :  { %v307_v3 = vmul.f32 %v4260_v60, %v299_v1  ;;  %4529 = vmatprep.mubr.msk.f32.mxu1 %vm272_vm4, %v5259_v2 }
 0x2c3   :  { %v5263_v4 = vadd.f32 %v4261_v62, %v307_v3 }
 0x2c5   :  { %4530 = vmatmul.mubr.msk.f32.vlgmr.msra.gmra.mxu1 %vm272_vm4, %v5263_v4 }
 0x2c6   :  { %4534 = vmatprep.mubr.msk.f32.mxu1 %vm5018_vm5, %v5017_v23 }
 0x385   :  { %v4531_v6 = vpop.f32.mrf.mxu1 }
 0x386   :  { %v5272_v8 = vadd.f32 %v4531_v6, %v4262_v5 }
 0x387   :  { %v402_v9 = vpop.f32.mrf.mxu1 }
 0x388   :  { %v5274_v10 = vadd.f32 %v4262_v5, %v402_v9 }
 0x38a   :  { %506 = vrot.lane.b32.xlu0 %v5274_v10, %s5019_s0  ;;  %412 = vrot.lane.b32.xlu1 %v5274_v10, %s5020_s5 }
 0x3fc   :  { %v413_v11 = vpop.permute.xlu1 %412  ;;  %v507_v12 = vpop.permute.xlu0 %506 }
 0x3fd   :  { %4533 = vmatpush3.xpose.msk.msra.mxu1 %vm414_vm6, %v413_v11 }
 0x3fe   :  { %4537 = vmatprep.subr.mxu1 %v5017_v23 }
 0x400   :  { %4535 = vmatmul.mubr.msk.f32.vlgmr.msra.gmra.mxu1 %vm414_vm6, %v5274_v10 }
 0x401   :  { %4538 = vmatpush3.msra.mxu1 %v507_v12  ;;  %4539 = vmatprep.mubr.msk.f32.mxu1 %vm5018_vm5, %v5017_v23 }
 0x402   :  { %4542 = vmatprep.subr.mxu1 %v5017_v23 }
 0x4c0   :  { %v485_v17 = vpop.f32.mrf.mxu1 }
 0x4c1   :  { %v489_v18 = vmul.f32 0.35355338, %v485_v17 }
 0x4c2   :  { %v4536_v19 = vpop.f32.mrf.mxu1 }
 0x4c3   :  { %v494_v20 = vadd.f32 %v5289_v16, %v489_v18 }
 0x4c5   :  { %v495_v21 = vsel %vm414_vm6, %v494_v20, -inf }
 0x4c6   :  { %496 = vmax.xlane.f32.xlu1 %v495_v21 }
 0x4d7   :  { %582 = vrot.lane.b32.xlu1 %v5274_v10, %s5021_s9 }
 0x54f   :  { %v497_v22 = vpop.xlane.xlu1 %496 }
 0x550   :  { %v498_v24 = vsub.f32 %v494_v20, %v497_v22 }
 0x552   :  { %v499_v25 = vmul.f32 1.442695, %v498_v24 }
 0x553   :  { %v583_v30 = vpop.permute.xlu1 %582 }
 0x554   :  { %4865 = vpow2.f32 %v499_v25 }
 0x561   :  { %v4866_v7 = vpop.eup %4865 }
 0x562   :  { %v501_v13 = vsel %vm414_vm6, %v4866_v7, 0.0 }
 0x563   :  { %502 = vadd.xlane.f32.xlu0 %v501_v13 }
 0x579   :  { %584 = vrot.lane.b32.xlu0 %v5274_v10, %s5022_s13 }
 0x5ec   :  { %v503_v26 = vpop.xlane.xlu0 %502 }
 0x5ed   :  { %4867 = vrcp.f32 %v503_v26 }
 0x5f0   :  { %v585_v29 = vpop.permute.xlu0 %584 }
 0x5fa   :  { %v4868_v27 = vpop.eup %4867 }
 0x5fb   :  { %v505_v28 = vmul.f32 %v4868_v27, %v4866_v7 }
 0x5fd   :  { %4540 = vmatmul.mubr.msk.f32.vlgmr.msra.gmra.mxu1 %vm414_vm6, %v505_v28 }
 0x5fe   :  { %4543 = vmatpush3.xpose.msk.msra.mxu1 %vm414_vm6, %v585_v29  ;;  %4544 = vmatprep.mubr.msk.f32.mxu1 %vm5018_vm5, %v5017_v23 }
 0x5ff   :  { %4547 = vmatprep.subr.mxu1 %v5017_v23 }
 0x601   :  { %4545 = vmatmul.mubr.msk.f32.vlgmr.msra.gmra.mxu1 %vm414_vm6, %v583_v30 }
 0x602   :  { %4549 = vmatprep.mubr.msk.f32.mxu1 %vm5018_vm5, %v5017_v23 }
 0x6bd   :  { %v5306_v31 = vpop.f32.mrf.mxu1 }
 0x6bf   :  { %v4541_v32 = vpop.f32.mrf.mxu1 }
 0x6c1   :  { %v656_v33 = vpop.f32.mrf.mxu1 }
 0x6c2   :  { %v660_v34 = vmul.f32 0.35355338, %v656_v33 }
 0x6c3   :  { %v4546_v35 = vpop.f32.mrf.mxu1 }
 0x6c4   :  { %v661_v36 = vadd.f32 %v660_v34, %v5289_v16 }
 0x6c6   :  { %v662_v37 = vsel %vm414_vm6, %v661_v36, -inf }
 0x6c7   :  { %663 = vmax.xlane.f32.xlu0 %v662_v37 }
 0x6dd   :  { %673 = vrot.lane.b32.xlu0 %v5274_v10, %s5023_s17 }
 0x6e1   :  { %749 = vrot.lane.b32.xlu0 %v5274_v10, %s5024_s21 }
 0x6e5   :  { %918 = vrot.lane.b32.xlu0 %v5274_v10, %s5025_s25 }
 0x6e9   :  { %916 = vrot.lane.b32.xlu0 %v5274_v10, %s5026_s29 }
 0x6ed   :  { %1101 = vrot.lane.b32.xlu0 %v5272_v8, %s5020_s5 }
 0x6f1   :  { %1270 = vrot.lane.b32.xlu0 %v5272_v8, %s5021_s9 }
 0x6f5   :  { %1437 = vrot.lane.b32.xlu0 %v5272_v8, %s5024_s21 }
 0x6f9   :  { %1604 = vrot.lane.b32.xlu0 %v5272_v8, %s5026_s29 }
 0x750   :  { %v664_v38 = vpop.xlane.xlu0 %663 }
 0x751   :  { %v665_v39 = vsub.f32 %v661_v36, %v664_v38 }
 0x753   :  { %v666_v40 = vmul.f32 1.442695, %v665_v39 }
 0x754   :  { %v674_v41 = vpop.permute.xlu0 %673 }
 0x755   :  { %4869 = vpow2.f32 %v666_v40  ;;  %4548 = vmatpush3.msra.mxu1 %v674_v41 }
 0x756   :  { %4552 = vmatprep.subr.mxu1 %v5017_v23 }
 0x758   :  { %v750_v45 = vpop.permute.xlu0 %749 }
 0x75c   :  { %v919_v46 = vpop.permute.xlu0 %918 }
 0x760   :  { %v917_v49 = vpop.permute.xlu0 %916 }
 0x762   :  { %v4870_v42 = vpop.eup %4869 }
 0x763   :  { %v668_v43 = vsel %vm414_vm6, %v4870_v42, 0.0 }
 0x764   :  { %669 = vadd.xlane.f32.xlu1 %v668_v43  ;;  %v1102_v51 = vpop.permute.xlu0 %1101 }
 0x768   :  { %v1271_v53 = vpop.permute.xlu0 %1270 }
 0x76c   :  { %v1438_v55 = vpop.permute.xlu0 %1437 }
 0x770   :  { %v1605_v57 = vpop.permute.xlu0 %1604 }
 0x775   :  { %751 = vrot.lane.b32.xlu1 %v5274_v10, %s5027_s3 }
 0x779   :  { %1272 = vrot.lane.b32.xlu1 %v5272_v8, %s5022_s13 }
 0x77d   :  { %1439 = vrot.lane.b32.xlu1 %v5272_v8, %s5027_s3 }
 0x781   :  { %1606 = vrot.lane.b32.xlu1 %v5272_v8, %s5025_s25 }
 0x7ed   :  { %v670_v44 = vpop.xlane.xlu1 %669 }
 0x7ee   :  { %4871 = vrcp.f32 %v670_v44 }
 0x7f1   :  { %v752_v50 = vpop.permute.xlu1 %751 }
 0x7f5   :  { %v1273_v52 = vpop.permute.xlu1 %1272 }
 0x7f9   :  { %v1440_v54 = vpop.permute.xlu1 %1439 }
 0x7fb   :  { %v4872_v47 = vpop.eup %4871 }
 0x7fc   :  { %v672_v48 = vmul.f32 %v4872_v47, %v4870_v42 }
 0x7fd   :  { %v1607_v56 = vpop.permute.xlu1 %1606 }
 0x7fe   :  { %4550 = vmatmul.mubr.msk.f32.vlgmr.msra.gmra.mxu1 %vm414_vm6, %v672_v48 }
 0x7ff   :  { %4553 = vmatpush3.xpose.msk.msra.mxu1 %vm414_vm6, %v752_v50  ;;  %4554 = vmatprep.mubr.msk.f32.mxu1 %vm5018_vm5, %v5017_v23 }
 0x800   :  { %4562 = vmatprep.subr.mxu1 %v5017_v23 }
 0x802   :  { %4555 = vmatmul.mubr.msk.f32.vlgmr.msra.gmra.mxu1 %vm414_vm6, %v750_v45 }
 0x803   :  { %4563 = vmatpush3.xpose.msk.msra.mxu1 %vm414_vm6, %v919_v46  ;;  %4564 = vmatprep.mubr.msk.f32.mxu1 %vm5018_vm5, %v5017_v23 }
 0x804   :  { %4572 = vmatprep.subr.mxu1 %v5017_v23 }
 0x806   :  { %4565 = vmatmul.mubr.msk.f32.vlgmr.msra.gmra.mxu1 %vm414_vm6, %v917_v49 }
 0x807   :  { %4573 = vmatpush3.xpose.msk.msra.mxu1 %vm414_vm6, %v1102_v51  ;;  %4574 = vmatprep.mubr.msk.f32.mxu1 %vm5018_vm5, %v5017_v23 }
 0x808   :  { %4582 = vmatprep.subr.mxu1 %v5017_v23 }
 0x80a   :  { %4575 = vmatmul.mubr.msk.f32.vlgmr.msra.gmra.mxu1 %vm414_vm6, %v5272_v8 }
 0x80b   :  { %4583 = vmatpush3.xpose.msk.msra.mxu1 %vm414_vm6, %v1273_v52  ;;  %4584 = vmatprep.mubr.msk.f32.mxu1 %vm5018_vm5, %v5017_v23 }
 0x80c   :  { %4592 = vmatprep.subr.mxu1 %v5017_v23 }
 0x80e   :  { %4585 = vmatmul.mubr.msk.f32.vlgmr.msra.gmra.mxu1 %vm414_vm6, %v1271_v53 }
 0x80f   :  { %4593 = vmatpush3.xpose.msk.msra.mxu1 %vm414_vm6, %v1440_v54  ;;  %4594 = vmatprep.mubr.msk.f32.mxu1 %vm5018_vm5, %v5017_v23 }
 0x810   :  { %4602 = vmatprep.subr.mxu1 %v5017_v23 }
 0x812   :  { %4595 = vmatmul.mubr.msk.f32.vlgmr.msra.gmra.mxu1 %vm414_vm6, %v1438_v55 }
 0x813   :  { %4603 = vmatpush3.xpose.msk.msra.mxu1 %vm414_vm6, %v1607_v56  ;;  %4604 = vmatprep.mubr.msk.f32.mxu1 %vm5018_vm5, %v5017_v23 }
 0x816   :  { %4605 = vmatmul.mubr.msk.f32.vlgmr.msra.gmra.mxu1 %vm414_vm6, %v1605_v57 }
 0x8be   :  { %v5367_v58 = vpop.f32.mrf.mxu1 }
 0x8c0   :  { %v4551_v59 = vpop.f32.mrf.mxu1 }
 0x8c2   :  { %v823_v60 = vpop.f32.mrf.mxu1 }
 0x8c3   :  { %v827_v61 = vmul.f32 0.35355338, %v823_v60 }
 0x8c4   :  { %v4556_v62 = vpop.f32.mrf.mxu1 }
 0x8c5   :  { %v828_v63 = vadd.f32 %v827_v61, %v5289_v16 }
 0x8c6   :  { %v990_v0 = vpop.f32.mrf.mxu1 }
 0x8c7   :  { %v994_v1 = vmul.f32 0.35355338, %v990_v0  ;;  %v829_v3 = vsel %vm414_vm6, %v828_v63, -inf }
 0x8c8   :  { %830 = vmax.xlane.f32.xlu1 %v829_v3  ;;  %v4566_v5 = vpop.f32.mrf.mxu1 }
 0x8c9   :  { %v995_v6 = vadd.f32 %v994_v1, %v5289_v16 }
 0x8ca   :  { %v1173_v9 = vpop.f32.mrf.mxu1 }
 0x8cb   :  { %v1177_v11 = vmul.f32 0.35355338, %v1173_v9  ;;  %v996_v12 = vsel %vm414_vm6, %v995_v6, -inf }
 0x8cc   :  { %997 = vmax.xlane.f32.xlu0 %v996_v12  ;;  %v4576_v14 = vpop.f32.mrf.mxu1 }
 0x8cd   :  { %v1182_v17 = vadd.f32 %v5234_v15, %v1177_v11 }
 0x8ce   :  { %v1344_v18 = vpop.f32.mrf.mxu1 }
 0x8cf   :  { %v1348_v19 = vmul.f32 0.35355338, %v1344_v18  ;;  %v1183_v20 = vsel %vm414_vm6, %v1182_v17, -inf }
 0x8d0   :  { %1184 = vmax.xlane.f32.xlu0 %v1183_v20  ;;  %v4586_v21 = vpop.f32.mrf.mxu1 }
 0x8d1   :  { %v1349_v22 = vadd.f32 %v1348_v19, %v5234_v15 }
 0x8d2   :  { %v1511_v24 = vpop.f32.mrf.mxu1 }
 0x8d3   :  { %v1515_v25 = vmul.f32 0.35355338, %v1511_v24  ;;  %v1350_v7 = vsel %vm414_vm6, %v1349_v22, -inf }
 0x8d4   :  { %1351 = vmax.xlane.f32.xlu1 %v1350_v7  ;;  %v4596_v13 = vpop.f32.mrf.mxu1 }
 0x8d5   :  { %v1516_v26 = vadd.f32 %v1515_v25, %v5234_v15 }
 0x8d6   :  { %v1678_v27 = vpop.f32.mrf.mxu1 }
 0x8d7   :  { %v1682_v28 = vmul.f32 0.35355338, %v1678_v27  ;;  %v1517_v29 = vsel %vm414_vm6, %v1516_v26, -inf }
 0x8d8   :  { %1518 = vmax.xlane.f32.xlu0 %v1517_v29  ;;  %v4606_v30 = vpop.f32.mrf.mxu1 }
 0x8d9   :  { %v1683_v32 = vadd.f32 %v1682_v28, %v5234_v15  ;;  %v1789_v30 = vld [vmem:[%s5087_s14 + $0x18] sm:$0xff] }
 0x8da   :  { %4612 = vmatprep.subr.mxu1 %v1789_v30 }
 0x8db   :  { %v1684_v33 = vsel %vm414_vm6, %v1683_v32, -inf  ;;  %4613 = vmatpush3.msra.mxu1 %v1789_v30 }
 0x8dc   :  { %1685 = vmax.xlane.f32.xlu1 %v1684_v33 }
 0x8ed   :  { %1007 = vrot.lane.b32.xlu1 %v5274_v10, %s5028_s8 }
 0x8ee   :  { %840 = vrot.lane.b32.xlu0 %v5274_v10, %s5029_s22 }
 0x8f1   :  { %1194 = vrot.lane.b32.xlu1 %v5272_v8, %s5019_s0 }
 0x951   :  { %v831_v34 = vpop.xlane.xlu1 %830 }
 0x952   :  { %v832_v35 = vsub.f32 %v828_v63, %v831_v34 }
 0x954   :  { %v833_v36 = vmul.f32 1.442695, %v832_v35 }
 0x955   :  { %v998_v37 = vpop.xlane.xlu0 %997 }
 0x956   :  { %4873 = vpow2.f32 %v833_v36  ;;  %v999_v38 = vsub.f32 %v995_v6, %v998_v37 }
 0x958   :  { %v1000_v39 = vmul.f32 1.442695, %v999_v38 }
 0x959   :  { %v1185_v40 = vpop.xlane.xlu0 %1184 }
 0x95a   :  { %4875 = vpow2.f32 %v1000_v39  ;;  %v1186_v41 = vsub.f32 %v1182_v17, %v1185_v40  ;;  %v1787_v40 = vld [vmem:[%s5087_s14 + $0x8] sm:$0xff] }
 0x95c   :  { %v1187_v42 = vmul.f32 1.442695, %v1186_v41  ;;  %v1786_v41 = vld [vmem:[%s5087_s14] sm:$0xff] }
 0x95d   :  { %v1352_v43 = vpop.xlane.xlu1 %1351 }
 0x95e   :  { %4877 = vpow2.f32 %v1187_v42  ;;  %v1353_v44 = vsub.f32 %v1349_v22, %v1352_v43 }
 0x960   :  { %v1354_v45 = vmul.f32 1.442695, %v1353_v44 }
 0x961   :  { %v1519_v46 = vpop.xlane.xlu0 %1518 }
 0x962   :  { %4879 = vpow2.f32 %v1354_v45  ;;  %v1520_v61 = vsub.f32 %v1516_v26, %v1519_v46 }
 0x963   :  { %v4874_v10 = vpop.eup %4873 }
 0x964   :  { %v835_v47 = vsel %vm414_vm6, %v4874_v10, 0.0  ;;  %v1521_v62 = vmul.f32 1.442695, %v1520_v61 }
 0x965   :  { %836 = vadd.xlane.f32.xlu0 %v835_v47  ;;  %v841_v48 = vpop.permute.xlu0 %840  ;;  %v1686_v49 = vpop.xlane.xlu1 %1685 }
 0x966   :  { %v1687_v50 = vsub.f32 %v1683_v32, %v1686_v49  ;;  %4558 = vmatpush3.msra.mxu0 %v841_v48  ;;  %v1788_v32 = vld [vmem:[%s5087_s14 + $0x10] sm:$0xff]  ;;  %s5761_s14 = sld [smem:[#allocation6_spill]] }
 0x967   :  { %v4876_v51 = vpop.eup %4875  ;;  %4567 = vmatprep.subr.mxu0 %v5017_v23  ;;  %4614 = vmatprep.subr.mxu1 %v1788_v32 }
 0x968   :  { %v1688_v52 = vmul.f32 1.442695, %v1687_v50  ;;  %v1002_v53 = vsel %vm414_vm6, %v4876_v51, 0.0  ;;  %4615 = vmatpush3.msra.mxu1 %v1788_v32  ;;  %v4293_v32 = vld [vmem:[%s5102_s30] ss:$0 sm:$0xff]  ;;  %s5764_s30 = sld [smem:[#allocation10_spill]] }
 0x969   :  { %1003 = vadd.xlane.f32.xlu1 %v1002_v53  ;;  %v1008_v1 = vpop.permute.xlu1 %1007  ;;  %4616 = vmatprep.subr.mxu1 %v1787_v40 }
 0x96a   :  { %4881 = vpow2.f32 %v1688_v52  ;;  %4617 = vmatpush3.msra.mxu1 %v1787_v40 }
 0x96b   :  { %v4878_v54 = vpop.eup %4877  ;;  %4883 = vpow2.f32 %v1521_v62  ;;  %4618 = vmatprep.subr.mxu1 %v1786_v41 }
 0x96c   :  { %v1189_v55 = vsel %vm414_vm6, %v4878_v54, 0.0  ;;  %4619 = vmatpush3.msra.mxu1 %v1786_v41  ;;  %v2037_v40 = vld [vmem:[%s5761_s14 + $0x18] sm:$0xff]  ;;  %v2036_v41 = vld [vmem:[%s5761_s14 + $0x10] sm:$0xff] }
 0x96d   :  { %1190 = vadd.xlane.f32.xlu0 %v1189_v55  ;;  %v1195_v3 = vpop.permute.xlu1 %1194 }
 0x96f   :  { %v4880_v56 = vpop.eup %4879 }
 0x970   :  { %v1356_v57 = vsel %vm414_vm6, %v4880_v56, 0.0 }
 0x971   :  { %1357 = vadd.xlane.f32.xlu1 %v1356_v57  ;;  %v4289_v57 = vld [vmem:[%s5092_s19] ss:$0 sm:$0xff]  ;;  %s5762_s19 = sld [smem:[#allocation5_spill]] }
 0x977   :  { %v4882_v59 = vpop.eup %4881 }
 0x978   :  { %v1690_v60 = vsel %vm414_vm6, %v4882_v59, 0.0  ;;  %v4884_v63 = vpop.eup %4883 }
 0x979   :  { %1691 = vadd.xlane.f32.xlu1 %v1690_v60  ;;  %v1523_v0 = vsel %vm414_vm6, %v4884_v63, 0.0 }
 0x983   :  { %1361 = vrot.lane.b32.xlu0 %v5272_v8, %s5023_s17 }
 0x98a   :  { %1528 = vrot.lane.b32.xlu1 %v5272_v8, %s5029_s22 }
 0x98e   :  { %1084 = vrot.lane.b32.xlu1 %v5367_v58, %s5030_s23 }
 0x9a2   :  { %1524 = vadd.xlane.f32.xlu0 %v1523_v0 }
 0x9b8   :  { %1695 = vrot.lane.b32.xlu0 %v5272_v8, %s5028_s8 }
 0x9ee   :  { %v837_v5 = vpop.xlane.xlu0 %836 }
 0x9ef   :  { %4885 = vrcp.f32 %v837_v5 }
 0x9f2   :  { %v1004_v6 = vpop.xlane.xlu1 %1003 }
 0x9f3   :  { %4887 = vrcp.f32 %v1004_v6 }
 0x9f6   :  { %v1191_v9 = vpop.xlane.xlu0 %1190 }
 0x9f7   :  { %4889 = vrcp.f32 %v1191_v9 }
 0x9fa   :  { %v1358_v11 = vpop.xlane.xlu1 %1357  ;;  %v1362_v20 = vpop.permute.xlu0 %1361 }
 0x9fb   :  { %4891 = vrcp.f32 %v1358_v11 }
 0x9fc   :  { %v4886_v12 = vpop.eup %4885 }
 0x9fd   :  { %v839_v58 = vmul.f32 %v4886_v12, %v4874_v10 }
 0x9ff   :  { %4560 = vmatmul.mubr.msk.f32.vlgmr.msra.gmra.mxu0 %vm414_vm6, %v839_v58 }
 0xa00   :  { %v4888_v14 = vpop.eup %4887  ;;  %4568 = vmatpush3.msra.mxu0 %v1008_v1  ;;  %4569 = vmatprep.mubr.msk.f32.mxu0 %vm5018_vm5, %v5017_v23 }
 0xa01   :  { %4577 = vmatprep.subr.mxu0 %v5017_v23  ;;  %v1006_v8 = vmul.f32 %v4888_v14, %v4876_v51 }
 0xa02   :  { %v1692_v18 = vpop.xlane.xlu1 %1691 }
 0xa03   :  { %4570 = vmatmul.mubr.msk.f32.vlgmr.msra.gmra.mxu0 %vm414_vm6, %v1006_v8  ;;  %v1927_v8 = vld [vmem:[%s5107_s6 + $0x18] sm:$0xff] }
 0xa04   :  { %v4890_v17 = vpop.eup %4889  ;;  %4578 = vmatpush3.msra.mxu0 %v1195_v3  ;;  %4579 = vmatprep.mubr.msk.f32.mxu0 %vm5018_vm5, %v5017_v23 }
 0xa05   :  { %4587 = vmatprep.subr.mxu0 %v5017_v23  ;;  %v1193_v19 = vmul.f32 %v4890_v17, %v4878_v54  ;;  %v1926_v17 = vld [vmem:[%s5107_s6 + $0x10] sm:$0xff] }
 0xa06   :  { %v1529_v24 = vpop.permute.xlu1 %1528 }
 0xa07   :  { %4580 = vmatmul.mubr.msk.f32.vlgmr.msra.gmra.mxu0 %vm414_vm6, %v1193_v19  ;;  %v1924_v19 = vld [vmem:[%s5107_s6] sm:$0xff] }
 0xa08   :  { %v4892_v21 = vpop.eup %4891  ;;  %4588 = vmatpush3.msra.mxu0 %v1362_v20  ;;  %4589 = vmatprep.mubr.msk.f32.mxu0 %vm5018_vm5, %v5017_v23 }
 0xa09   :  { %4597 = vmatprep.subr.mxu0 %v5017_v23  ;;  %v1360_v22 = vmul.f32 %v4892_v21, %v4880_v56 }
 0xa0a   :  { %v1085_v46 = vpop.permute.xlu1 %1084 }
 0xa0b   :  { %4590 = vmatmul.mubr.msk.f32.vlgmr.msra.gmra.mxu0 %vm414_vm6, %v1360_v22  ;;  %v1095_v47 = vsel %vm414_vm6, %v5306_v31, %v1085_v46 }
 0xa0c   :  { %4598 = vmatpush3.msra.mxu0 %v1529_v24  ;;  %4599 = vmatprep.mubr.msk.f32.mxu0 %vm5018_vm5, %v5017_v23 }
 0xa0d   :  { %4607 = vmatprep.subr.mxu0 %v5017_v23 }
 0xa2b   :  { %v1525_v25 = vpop.xlane.xlu0 %1524 }
 0xa2c   :  { %4893 = vrcp.f32 %v1525_v25 }
 0xa2d   :  { %4895 = vrcp.f32 %v1692_v18  ;;  %v1925_v18 = vld [vmem:[%s5107_s6 + $0x8] sm:$0xff]  ;;  %s5765_s6 = sld [smem:[#allocation8_spill]] }
 0xa2f   :  { %v1696_v27 = vpop.permute.xlu0 %1695 }
 0xa39   :  { %v4894_v7 = vpop.eup %4893 }
 0xa3a   :  { %v1527_v13 = vmul.f32 %v4894_v7, %v4884_v63  ;;  %v4896_v26 = vpop.eup %4895 }
 0xa3b   :  { %v1694_v28 = vmul.f32 %v4896_v26, %v4882_v59  ;;  %v4292_v26 = vld [vmem:[%s5097_s24] ss:$0 sm:$0xff]  ;;  %s5763_s24 = sld [smem:[#allocation7_spill]] }
 0xa3c   :  { %4600 = vmatmul.mubr.msk.f32.vlgmr.msra.gmra.mxu0 %vm414_vm6, %v1527_v13 }
 0xa3d   :  { %4608 = vmatpush3.msra.mxu0 %v1696_v27  ;;  %4609 = vmatprep.mubr.msk.f32.mxu0 %vm5018_vm5, %v5017_v23 }
 0xa3e   :  { %4623 = vmatprep.subr.mxu0 %v1927_v8 }
 0xa40   :  { %4610 = vmatmul.mubr.msk.f32.vlgmr.msra.gmra.mxu0 %vm414_vm6, %v1694_v28 }
 0xa41   :  { %4624 = vmatpush3.msra.mxu0 %v1927_v8 }
 0xa42   :  { %4625 = vmatprep.subr.mxu0 %v1926_v17 }
 0xa43   :  { %4626 = vmatpush3.msra.mxu0 %v1926_v17 }
 0xa44   :  { %4627 = vmatprep.subr.mxu0 %v1925_v18 }
 0xa45   :  { %4628 = vmatpush3.msra.mxu0 %v1925_v18 }
 0xa46   :  { %4629 = vmatprep.subr.mxu0 %v1924_v19 }
 0xa47   :  { %4630 = vmatpush3.msra.mxu0 %v1924_v19 }
 0xabf   :  { %v912_v29 = vpop.f32.mrf.mxu0 }
 0xac0   :  { %1088 = vrot.lane.b32.xlu0 %v912_v29, %s5031_s26 }
 0xac1   :  { %v4561_v33 = vpop.f32.mrf.mxu0 }
 0xac3   :  { %v1079_v34 = vpop.f32.mrf.mxu0 }
 0xac4   :  { %1092 = vrot.lane.b32.xlu0 %v1079_v34, %s5032_s28 }
 0xac5   :  { %v4571_v35 = vpop.f32.mrf.mxu0 }
 0xac7   :  { %v1266_v36 = vpop.f32.mrf.mxu0 }
 0xac9   :  { %v4581_v37 = vpop.f32.mrf.mxu0 }
 0xaca   :  { %v2040_v37 = vld [vmem:[%s5761_s14 + $0x30] sm:$0xff] }
 0xacb   :  { %v1433_v38 = vpop.f32.mrf.mxu0 }
 0xacc   :  { %1772 = vrot.lane.b32.xlu1 %v1433_v38, %s5030_s23  ;;  %v2039_v38 = vld [vmem:[%s5761_s14 + $0x28] sm:$0xff] }
 0xacd   :  { %v4591_v39 = vpop.f32.mrf.mxu0 }
 0xace   :  { %v2038_v39 = vld [vmem:[%s5761_s14 + $0x20] sm:$0xff] }
 0xafc   :  { %v1600_v42 = vpop.f32.mrf.mxu0 }
 0xafd   :  { %1776 = vrot.lane.b32.xlu1 %v1600_v42, %s5031_s26  ;;  %v2035_v42 = vld [vmem:[%s5761_s14 + $0x8] sm:$0xff] }
 0xafe   :  { %v4601_v43 = vpop.f32.mrf.mxu0 }
 0xaff   :  { %v2034_v43 = vld [vmem:[%s5761_s14] sm:$0xff] }
 0xb00   :  { %v1767_v44 = vpop.f32.mrf.mxu0 }
 0xb01   :  { %1780 = vrot.lane.b32.xlu0 %v1767_v44, %s5032_s28  ;;  %v4294_v44 = vld [vmem:[%s5762_s19] ss:$0 sm:$0xff] }
 0xb02   :  { %v4611_v45 = vpop.f32.mrf.mxu0 }
 0xb32   :  { %v1089_v10 = vpop.permute.xlu0 %1088 }
 0xb33   :  { %v1097_v48 = vsel %vm1096_vm7, %v1095_v47, %v1089_v10 }
 0xb36   :  { %v1093_v49 = vpop.permute.xlu0 %1092 }
 0xb37   :  { %v1099_v50 = vsel %vm1098_vm8, %v1097_v48, %v1093_v49 }
 0xb38   :  { %4620 = vmatprep.mubr.msk.f32.mxu1 %vm272_vm4, %v1099_v50 }
 0xb3e   :  { %v1773_v51 = vpop.permute.xlu1 %1772 }
 0xb3f   :  { %v1783_v53 = vsel %vm414_vm6, %v1266_v36, %v1773_v51  ;;  %v2041_v36 = vld [vmem:[%s5761_s14 + $0x38] sm:$0xff] }
 0xb40   :  { %4634 = vmatprep.subr.mxu1 %v2041_v36 }
 0xb6f   :  { %v1777_v52 = vpop.permute.xlu1 %1776 }
 0xb70   :  { %v1784_v54 = vsel %vm1096_vm7, %v1783_v53, %v1777_v52 }
 0xb73   :  { %v1781_v55 = vpop.permute.xlu0 %1780 }
 0xb74   :  { %v1785_v56 = vsel %vm1098_vm8, %v1784_v54, %v1781_v55 }
 0xb75   :  { %4621 = vmatmul.mubr.msk.f32.vlgmr.msra.gmra.mxu1 %vm272_vm4, %v1785_v56 }
 0xb76   :  { %4635 = vmatpush3.msra.mxu1 %v2041_v36  ;;  %v4300_v36 = vld [vmem:[%s5765_s6] ss:$0 sm:$0xff] }
 0xb77   :  { %4636 = vmatprep.subr.mxu1 %v2040_v37 }
 0xb78   :  { %4637 = vmatpush3.msra.mxu1 %v2040_v37 }
 0xb79   :  { %4638 = vmatprep.subr.mxu1 %v2039_v38 }
 0xb7a   :  { %4639 = vmatpush3.msra.mxu1 %v2039_v38 }
 0xb7b   :  { %4640 = vmatprep.subr.mxu1 %v2038_v39 }
 0xb7c   :  { %4641 = vmatpush3.msra.mxu1 %v2038_v39 }
 0xb7d   :  { %4642 = vmatprep.subr.mxu1 %v2037_v40 }
 0xb7e   :  { %4643 = vmatpush3.msra.mxu1 %v2037_v40 }
 0xb7f   :  { %4644 = vmatprep.subr.mxu1 %v2036_v41 }
 0xb80   :  { %4645 = vmatpush3.msra.mxu1 %v2036_v41  ;;  %v4301_v41 = vld [vmem:[%s5766_s1] ss:$0 sm:$0xff] }
 0xb81   :  { %4646 = vmatprep.subr.mxu1 %v2035_v42 }
 0xb82   :  { %4647 = vmatpush3.msra.mxu1 %v2035_v42 }
 0xb83   :  { %4648 = vmatprep.subr.mxu1 %v2034_v43 }
 0xb84   :  { %4649 = vmatpush3.msra.mxu1 %v2034_v43 }
 0xb85   :  { %4674 = vmatprep.subr.mxu1 %v5017_v23 }
 0xc35   :  { %v4622_v31 = vpop.f32.mrf.mxu1 }
 0xc36   :  { %v1875_v59 = vadd.f32 %v4622_v31, %v4289_v57 }
 0xc37   :  { %v1869_v60 = vpop.f32.mrf.mxu1 }
 0xc38   :  { %v1870_v61 = vadd.f32 %v4289_v57, %v1869_v60  ;;  %v1879_v62 = vadd.f32 %v1875_v59, %v5263_v4 }
 0xc3a   :  { %v1885_v63 = vsel %vm272_vm4, %v1879_v62, 0.0  ;;  %v1878_v0 = vadd.f32 %v1870_v61, %v5259_v2 }
 0xc3b   :  { %1886 = vadd.xlane.f32.xlu0 %v1885_v63 }
 0xc3c   :  { %v1882_v1 = vsel %vm272_vm4, %v1878_v0, 0.0 }
 0xc3d   :  { %1883 = vadd.xlane.f32.xlu1 %v1882_v1 }
 0xcc4   :  { %v1887_v3 = vpop.xlane.xlu0 %1886 }
 0xcc5   :  { %v1889_v5 = vmul.f32 0.03125, %v1887_v3  ;;  %v4297_v3 = vld [vmem:[%s5763_s24] ss:$0 sm:$0xff] }
 0xcc6   :  { %v1884_v6 = vpop.xlane.xlu1 %1883 }
 0xcc7   :  { %v1891_v9 = vsub.f32 %v1879_v62, %v1889_v5  ;;  %v1888_v11 = vmul.f32 0.03125, %v1884_v6 }
 0xcc9   :  { %v1890_v12 = vsub.f32 %v1878_v0, %v1888_v11  ;;  %v1893_v58 = vmul.f32 %v1891_v9, %v1891_v9 }
 0xccb   :  { %v1897_v4 = vsel %vm272_vm4, %v1893_v58, 0.0  ;;  %v1892_v14 = vmul.f32 %v1890_v12, %v1890_v12 }
 0xccc   :  { %1898 = vadd.xlane.f32.xlu1 %v1897_v4 }
 0xccd   :  { %v1894_v2 = vsel %vm272_vm4, %v1892_v14, 0.0 }
 0xcce   :  { %1895 = vadd.xlane.f32.xlu0 %v1894_v2 }
 0xd55   :  { %v1899_v20 = vpop.xlane.xlu1 %1898 }
 0xd56   :  { %v1901_v21 = vmul.f32 0.03125, %v1899_v20 }
 0xd57   :  { %v1896_v22 = vpop.xlane.xlu0 %1895 }
 0xd58   :  { %v1903_v24 = vadd.f32 1e-12, %v1901_v21  ;;  %v1900_v25 = vmul.f32 0.03125, %v1896_v22 }
 0xd5a   :  { %4897 = vrsqrt.f32 %v1903_v24  ;;  %v1902_v7 = vadd.f32 1e-12, %v1900_v25 }
 0xd5c   :  { %4899 = vrsqrt.f32 %v1902_v7  ;;  %v2180_v7 = vld [vmem:[%s5764_s30 + $0x18] sm:$0xff] }
 0xd5d   :  { %4653 = vmatprep.subr.mxu0 %v2180_v7 }
 0xd67   :  { %v4898_v13 = vpop.eup %4897 }
 0xd68   :  { %v1907_v27 = vmul.f32 %v4898_v13, %v1891_v9  ;;  %v2179_v13 = vld [vmem:[%s5764_s30 + $0x10] sm:$0xff] }
 0xd69   :  { %v4900_v28 = vpop.eup %4899 }
 0xd6a   :  { %v1906_v29 = vmul.f32 %v4900_v28, %v1890_v12  ;;  %v1915_v30 = vmul.f32 %v4292_v26, %v1907_v27  ;;  %v2177_v27 = vld [vmem:[%s5764_s30] sm:$0xff] }
 0xd6c   :  { %v1914_v33 = vmul.f32 %v4292_v26, %v1906_v29  ;;  %v1923_v35 = vadd.f32 %v4293_v32, %v1915_v30  ;;  %v2178_v26 = vld [vmem:[%s5764_s30 + $0x8] sm:$0xff] }
 0xd6e   :  { %v5453_v34 = vadd.f32 %v4293_v32, %v1914_v33 }
 0xd70   :  { %4631 = vmatprep.mubr.msk.f32.mxu0 %vm272_vm4, %v5453_v34 }
 0xd71   :  { %4632 = vmatmul.mubr.msk.f32.vlgmr.msra.gmra.mxu0 %vm272_vm4, %v1923_v35 }
 0xd72   :  { %4654 = vmatpush3.msra.mxu0 %v2180_v7 }
 0xd73   :  { %4655 = vmatprep.subr.mxu0 %v2179_v13 }
 0xd74   :  { %4656 = vmatpush3.msra.mxu0 %v2179_v13 }
 0xd75   :  { %4657 = vmatprep.subr.mxu0 %v2178_v26 }
 0xd76   :  { %4658 = vmatpush3.msra.mxu0 %v2178_v26 }
 0xd77   :  { %4659 = vmatprep.subr.mxu0 %v2177_v27 }
 0xd78   :  { %4660 = vmatpush3.msra.mxu0 %v2177_v27 }
 0xd79   :  { %4664 = vmatprep.subr.mxu0 %v5017_v23 }
 0xe31   :  { %v4633_v45 = vpop.f32.mrf.mxu0 }
 0xe32   :  { %v2013_v46 = vadd.f32 %v4633_v45, %v4294_v44 }
 0xe33   :  { %v2007_v10 = vpop.f32.mrf.mxu0 }
 0xe34   :  { %v2017_v47 = vmul.f32 %v2013_v46, %v2013_v46  ;;  %v2008_v48 = vadd.f32 %v4294_v44, %v2007_v10 }
 0xe36   :  { %v2019_v49 = vmul.f32 %v2017_v47, %v2013_v46  ;;  %v2016_v50 = vmul.f32 %v2008_v48, %v2008_v48 }
 0xe38   :  { %v2021_v51 = vmul.f32 0.044715, %v2019_v49  ;;  %v2018_v52 = vmul.f32 %v2016_v50, %v2008_v48 }
 0xe3a   :  { %v2023_v53 = vadd.f32 %v2021_v51, %v2013_v46  ;;  %v2020_v54 = vmul.f32 0.044715, %v2018_v52 }
 0xe3c   :  { %v2025_v55 = vmul.f32 0.7978846, %v2023_v53  ;;  %v2022_v56 = vadd.f32 %v2020_v54, %v2008_v48 }
 0xe3e   :  { %4901 = vtanh.f32 %v2025_v55  ;;  %v2024_v57 = vmul.f32 0.7978846, %v2022_v56 }
 0xe40   :  { %4903 = vtanh.f32 %v2024_v57 }
 0xe4b   :  { %v4902_v31 = vpop.eup %4901 }
 0xe4c   :  { %v2029_v59 = vadd.f32 1.0, %v4902_v31 }
 0xe4d   :  { %v4904_v60 = vpop.eup %4903 }
 0xe4e   :  { %v2028_v61 = vadd.f32 1.0, %v4904_v60  ;;  %v2031_v62 = vmul.f32 0.5, %v2029_v59 }
 0xe50   :  { %v2030_v63 = vmul.f32 0.5, %v2028_v61  ;;  %v2033_v1 = vmul.f32 %v2031_v62, %v2013_v46  ;;  %v4302_v46 = vld [vmem:[%s5767_s2] ss:$0 sm:$0xff] }
 0xe52   :  { %v2032_v0 = vmul.f32 %v2030_v63, %v2008_v48 }
 0xe54   :  { %4650 = vmatprep.mubr.msk.f32.mxu1 %vm2049_vm9, %v2032_v0 }
 0xe55   :  { %4651 = vmatmul.mubr.msk.f32.vlgmr.msra.gmra.mxu1 %vm2049_vm9, %v2033_v1 }
 0xe56   :  { %4676 = vmatprep.mubr.msk.f32.mxu1 %vm5018_vm5, %v5017_v23 }
 0xf15   :  { %v4652_v5 = vpop.f32.mrf.mxu1 }
 0xf16   :  { %v2128_v6 = vadd.f32 %v4652_v5, %v4297_v3 }
 0xf17   :  { %v2122_v9 = vpop.f32.mrf.mxu1 }
 0xf18   :  { %v2123_v11 = vadd.f32 %v4297_v3, %v2122_v9  ;;  %v2132_v12 = vadd.f32 %v2128_v6, %v1923_v35 }
 0xf1a   :  { %v2138_v58 = vsel %vm272_vm4, %v2132_v12, 0.0  ;;  %v2131_v4 = vadd.f32 %v2123_v11, %v5453_v34 }
 0xf1b   :  { %2139 = vadd.xlane.f32.xlu1 %v2138_v58 }
 0xf1c   :  { %v2135_v14 = vsel %vm272_vm4, %v2131_v4, 0.0 }
 0xf1d   :  { %2136 = vadd.xlane.f32.xlu0 %v2135_v14 }
 0xfa4   :  { %v2140_v2 = vpop.xlane.xlu1 %2139 }
 0xfa5   :  { %v2142_v8 = vmul.f32 0.03125, %v2140_v2 }
 0xfa6   :  { %v2137_v17 = vpop.xlane.xlu0 %2136 }
 0xfa7   :  { %v2144_v18 = vsub.f32 %v2132_v12, %v2142_v8  ;;  %v2141_v19 = vmul.f32 0.03125, %v2137_v17 }
 0xfa9   :  { %v2143_v20 = vsub.f32 %v2131_v4, %v2141_v19  ;;  %v2146_v21 = vmul.f32 %v2144_v18, %v2144_v18 }
 0xfab   :  { %v2150_v22 = vsel %vm272_vm4, %v2146_v21, 0.0  ;;  %v2145_v24 = vmul.f32 %v2143_v20, %v2143_v20 }
 0xfac   :  { %2151 = vadd.xlane.f32.xlu1 %v2150_v22 }
 0xfad   :  { %v2147_v25 = vsel %vm272_vm4, %v2145_v24, 0.0 }
 0xfae   :  { %2148 = vadd.xlane.f32.xlu0 %v2147_v25 }
0x1035   :  { %v2152_v28 = vpop.xlane.xlu1 %2151 }
0x1036   :  { %v2154_v29 = vmul.f32 0.03125, %v2152_v28 }
0x1037   :  { %v2149_v30 = vpop.xlane.xlu0 %2148 }
0x1038   :  { %v2156_v32 = vadd.f32 1e-12, %v2154_v29  ;;  %v2153_v33 = vmul.f32 0.03125, %v2149_v30 }
0x103a   :  { %4905 = vrsqrt.f32 %v2156_v32  ;;  %v2155_v34 = vadd.f32 1e-12, %v2153_v33 }
0x103c   :  { %4907 = vrsqrt.f32 %v2155_v34 }
0x1047   :  { %v4906_v35 = vpop.eup %4905 }
0x1048   :  { %v2160_v37 = vmul.f32 %v4906_v35, %v2144_v18 }
0x1049   :  { %v4908_v38 = vpop.eup %4907 }
0x104a   :  { %v2159_v39 = vmul.f32 %v4908_v38, %v2143_v20  ;;  %v2168_v40 = vmul.f32 %v4300_v36, %v2160_v37 }
0x104c   :  { %v2167_v42 = vmul.f32 %v4300_v36, %v2159_v39  ;;  %v5487_v44 = vadd.f32 %v4301_v41, %v2168_v40 }
0x104e   :  { %v5485_v43 = vadd.f32 %v4301_v41, %v2167_v42 }
0x1050   :  { %4661 = vmatprep.mubr.msk.f32.mxu0 %vm272_vm4, %v5485_v43 }
0x1051   :  { %4662 = vmatmul.mubr.msk.f32.vlgmr.msra.gmra.mxu0 %vm272_vm4, %v5487_v44 }
0x1052   :  { %4666 = vmatprep.mubr.msk.f32.mxu0 %vm5018_vm5, %v5017_v23 }
0x1111   :  { %v4663_v45 = vpop.f32.mrf.mxu0 }
0x1112   :  { %v5510_v48 = vadd.f32 %v4663_v45, %v4302_v46 }
0x1113   :  { %v2260_v10 = vpop.f32.mrf.mxu0 }
0x1114   :  { %v5496_v47 = vadd.f32 %v4302_v46, %v2260_v10 }
0x1116   :  { %2437 = vrot.lane.b32.xlu1 %v5496_v47, %s5022_s13  ;;  %2270 = vrot.lane.b32.xlu0 %v5496_v47, %s5020_s5 }
0x111a   :  { %2435 = vrot.lane.b32.xlu1 %v5496_v47, %s5021_s9  ;;  %2604 = vrot.lane.b32.xlu0 %v5496_v47, %s5027_s3 }
0x111e   :  { %2602 = vrot.lane.b32.xlu1 %v5496_v47, %s5024_s21  ;;  %2771 = vrot.lane.b32.xlu0 %v5496_v47, %s5025_s25 }
0x1122   :  { %2769 = vrot.lane.b32.xlu1 %v5496_v47, %s5026_s29  ;;  %2952 = vrot.lane.b32.xlu0 %v5510_v48, %s5020_s5  ;;  %s5775_s5 = sld [smem:[#allocation19_spill]] }
0x1126   :  { %3119 = vrot.lane.b32.xlu1 %v5510_v48, %s5022_s13  ;;  %3117 = vrot.lane.b32.xlu0 %v5510_v48, %s5021_s9  ;;  %s5776_s9 = sld [smem:[#allocation22_spill]] }
0x1127   :  { %s5777_s13 = sld [smem:[#allocation20_spill]] }
0x112a   :  { %3286 = vrot.lane.b32.xlu1 %v5510_v48, %s5027_s3  ;;  %3284 = vrot.lane.b32.xlu0 %v5510_v48, %s5024_s21 }
0x112e   :  { %3453 = vrot.lane.b32.xlu1 %v5510_v48, %s5025_s25  ;;  %3451 = vrot.lane.b32.xlu0 %v5510_v48, %s5026_s29 }
0x1132   :  { %2359 = vrot.lane.b32.xlu1 %v5496_v47, %s5019_s0 }
0x1188   :  { %v2438_v49 = vpop.permute.xlu1 %2437  ;;  %v2271_v50 = vpop.permute.xlu0 %2270 }
0x1189   :  { %4665 = vmatpush3.xpose.msk.msra.mxu0 %vm414_vm6, %v2271_v50  ;;  %4675 = vmatpush3.xpose.msk.msra.mxu1 %vm414_vm6, %v2438_v49 }
0x118a   :  { %4684 = vmatprep.subr.mxu1 %v5017_v23  ;;  %4669 = vmatprep.subr.mxu0 %v5017_v23 }
0x118c   :  { %v2436_v51 = vpop.permute.xlu1 %2435  ;;  %4667 = vmatmul.mubr.msk.f32.vlgmr.msra.gmra.mxu0 %vm414_vm6, %v5496_v47  ;;  %v2605_v52 = vpop.permute.xlu0 %2604 }
0x118d   :  { %4677 = vmatmul.mubr.msk.f32.vlgmr.msra.gmra.mxu1 %vm414_vm6, %v2436_v51  ;;  %4671 = vmatprep.mubr.msk.f32.mxu0 %vm5018_vm5, %v5017_v23 }
0x118e   :  { %4685 = vmatpush3.xpose.msk.msra.mxu1 %vm414_vm6, %v2605_v52  ;;  %4686 = vmatprep.mubr.msk.f32.mxu1 %vm5018_vm5, %v5017_v23 }
0x118f   :  { %4694 = vmatprep.subr.mxu1 %v5017_v23 }
0x1190   :  { %v2603_v53 = vpop.permute.xlu1 %2602  ;;  %v2772_v54 = vpop.permute.xlu0 %2771 }
0x1191   :  { %4687 = vmatmul.mubr.msk.f32.vlgmr.msra.gmra.mxu1 %vm414_vm6, %v2603_v53 }
0x1192   :  { %4695 = vmatpush3.xpose.msk.msra.mxu1 %vm414_vm6, %v2772_v54  ;;  %4696 = vmatprep.mubr.msk.f32.mxu1 %vm5018_vm5, %v5017_v23 }
0x1193   :  { %4704 = vmatprep.subr.mxu1 %v5017_v23 }
0x1194   :  { %v2770_v55 = vpop.permute.xlu1 %2769  ;;  %v2953_v56 = vpop.permute.xlu0 %2952 }
0x1195   :  { %4697 = vmatmul.mubr.msk.f32.vlgmr.msra.gmra.mxu1 %vm414_vm6, %v2770_v55 }
0x1196   :  { %4705 = vmatpush3.xpose.msk.msra.mxu1 %vm414_vm6, %v2953_v56  ;;  %4706 = vmatprep.mubr.msk.f32.mxu1 %vm5018_vm5, %v5017_v23 }
0x1197   :  { %4714 = vmatprep.subr.mxu1 %v5017_v23 }
0x1198   :  { %v3120_v57 = vpop.permute.xlu1 %3119  ;;  %v3118_v31 = vpop.permute.xlu0 %3117 }
0x1199   :  { %4707 = vmatmul.mubr.msk.f32.vlgmr.msra.gmra.mxu1 %vm414_vm6, %v5510_v48 }
0x119a   :  { %4715 = vmatpush3.xpose.msk.msra.mxu1 %vm414_vm6, %v3120_v57  ;;  %4716 = vmatprep.mubr.msk.f32.mxu1 %vm5018_vm5, %v5017_v23 }
0x119b   :  { %4724 = vmatprep.subr.mxu1 %v5017_v23 }
0x119c   :  { %v3287_v59 = vpop.permute.xlu1 %3286  ;;  %v3285_v60 = vpop.permute.xlu0 %3284 }
0x119d   :  { %4717 = vmatmul.mubr.msk.f32.vlgmr.msra.gmra.mxu1 %vm414_vm6, %v3118_v31 }
0x119e   :  { %4725 = vmatpush3.xpose.msk.msra.mxu1 %vm414_vm6, %v3287_v59  ;;  %4726 = vmatprep.mubr.msk.f32.mxu1 %vm5018_vm5, %v5017_v23 }
0x119f   :  { %4734 = vmatprep.subr.mxu1 %v5017_v23 }
0x11a0   :  { %v3454_v61 = vpop.permute.xlu1 %3453  ;;  %v3452_v62 = vpop.permute.xlu0 %3451 }
0x11a1   :  { %4727 = vmatmul.mubr.msk.f32.vlgmr.msra.gmra.mxu1 %vm414_vm6, %v3285_v60 }
0x11a2   :  { %4735 = vmatpush3.xpose.msk.msra.mxu1 %vm414_vm6, %v3454_v61  ;;  %4736 = vmatprep.mubr.msk.f32.mxu1 %vm5018_vm5, %v5017_v23 }
0x11a4   :  { %v2360_v63 = vpop.permute.xlu1 %2359 }
0x11a5   :  { %4670 = vmatpush3.msra.mxu0 %v2360_v63  ;;  %4737 = vmatmul.mubr.msk.f32.vlgmr.msra.gmra.mxu1 %vm414_vm6, %v3452_v62 }
0x11a6   :  { %4679 = vmatprep.subr.mxu0 %v5017_v23 }
0x124c   :  { %v2342_v0 = vpop.f32.mrf.mxu0 }
0x124d   :  { %v2346_v1 = vmul.f32 0.35355338, %v2342_v0  ;;  %v2509_v3 = vpop.f32.mrf.mxu1 }
0x124e   :  { %v2513_v5 = vmul.f32 0.35355338, %v2509_v3  ;;  %v4668_v6 = vpop.f32.mrf.mxu0 }
0x124f   :  { %v4678_v9 = vpop.f32.mrf.mxu1  ;;  %v2347_v11 = vadd.f32 %v2346_v1, %v5289_v16 }
0x1250   :  { %v2514_v12 = vadd.f32 %v2513_v5, %v5289_v16 }
0x1251   :  { %v2676_v58 = vpop.f32.mrf.mxu1  ;;  %v2348_v4 = vsel %vm414_vm6, %v2347_v11, -inf }
0x1252   :  { %v2680_v14 = vmul.f32 0.35355338, %v2676_v58  ;;  %2349 = vmax.xlane.f32.xlu1 %v2348_v4  ;;  %v2515_v2 = vsel %vm414_vm6, %v2514_v12, -inf }
0x1253   :  { %2516 = vmax.xlane.f32.xlu0 %v2515_v2  ;;  %v4688_v8 = vpop.f32.mrf.mxu1 }
0x1254   :  { %v2681_v17 = vadd.f32 %v2680_v14, %v5289_v16 }
0x1255   :  { %v2843_v18 = vpop.f32.mrf.mxu1 }
0x1256   :  { %v2847_v19 = vmul.f32 0.35355338, %v2843_v18  ;;  %v2682_v20 = vsel %vm414_vm6, %v2681_v17, -inf }
0x1257   :  { %2683 = vmax.xlane.f32.xlu0 %v2682_v20  ;;  %v4698_v21 = vpop.f32.mrf.mxu1 }
0x1258   :  { %v2848_v22 = vadd.f32 %v2847_v19, %v5289_v16 }
0x1259   :  { %v3024_v24 = vpop.f32.mrf.mxu1 }
0x125a   :  { %v3028_v25 = vmul.f32 0.35355338, %v3024_v24  ;;  %v2849_v7 = vsel %vm414_vm6, %v2848_v22, -inf }
0x125b   :  { %2850 = vmax.xlane.f32.xlu1 %v2849_v7  ;;  %v4708_v13 = vpop.f32.mrf.mxu1 }
0x125c   :  { %v3029_v26 = vadd.f32 %v3028_v25, %v5234_v15 }
0x125d   :  { %v3191_v27 = vpop.f32.mrf.mxu1 }
0x125e   :  { %v3195_v28 = vmul.f32 0.35355338, %v3191_v27  ;;  %v3030_v29 = vsel %vm414_vm6, %v3029_v26, -inf }
0x125f   :  { %3031 = vmax.xlane.f32.xlu0 %v3030_v29  ;;  %v4718_v30 = vpop.f32.mrf.mxu1 }
0x1260   :  { %v3196_v32 = vadd.f32 %v3195_v28, %v5234_v15 }
0x1261   :  { %v3358_v33 = vpop.f32.mrf.mxu1 }
0x1262   :  { %v3362_v34 = vmul.f32 0.35355338, %v3358_v33  ;;  %v3197_v16 = vsel %vm414_vm6, %v3196_v32, -inf }
0x1263   :  { %3198 = vmax.xlane.f32.xlu1 %v3197_v16  ;;  %v4728_v35 = vpop.f32.mrf.mxu1 }
0x1264   :  { %v3363_v36 = vadd.f32 %v3362_v34, %v5234_v15 }
0x1265   :  { %v3525_v37 = vpop.f32.mrf.mxu1 }
0x1266   :  { %v3364_v38 = vsel %vm414_vm6, %v3363_v36, -inf  ;;  %v3529_v40 = vmul.f32 0.35355338, %v3525_v37 }
0x1267   :  { %3365 = vmax.xlane.f32.xlu0 %v3364_v38  ;;  %v4738_v39 = vpop.f32.mrf.mxu1 }
0x1268   :  { %v3530_v41 = vadd.f32 %v3529_v40, %v5234_v15 }
0x126a   :  { %v3531_v42 = vsel %vm414_vm6, %v3530_v41, -inf }
0x1274   :  { %2693 = vrot.lane.b32.xlu1 %v5496_v47, %s5029_s22 }
0x127d   :  { %2526 = vrot.lane.b32.xlu0 %v5496_v47, %s5023_s17 }
0x1298   :  { %3532 = vmax.xlane.f32.xlu1 %v3531_v42 }
0x12a9   :  { %2860 = vrot.lane.b32.xlu1 %v5496_v47, %s5028_s8 }
0x12db   :  { %v2350_v45 = vpop.xlane.xlu1 %2349 }
0x12dc   :  { %v2351_v46 = vsub.f32 %v2347_v11, %v2350_v45  ;;  %v2517_v10 = vpop.xlane.xlu0 %2516 }
0x12dd   :  { %v2518_v49 = vsub.f32 %v2514_v12, %v2517_v10 }
0x12de   :  { %v2352_v50 = vmul.f32 1.442695, %v2351_v46 }
0x12df   :  { %v2519_v51 = vmul.f32 1.442695, %v2518_v49 }
0x12e0   :  { %4909 = vpow2.f32 %v2352_v50  ;;  %v2684_v52 = vpop.xlane.xlu0 %2683 }
0x12e1   :  { %4911 = vpow2.f32 %v2519_v51  ;;  %v2685_v53 = vsub.f32 %v2681_v17, %v2684_v52 }
0x12e3   :  { %v2686_v54 = vmul.f32 1.442695, %v2685_v53 }
0x12e4   :  { %v2851_v59 = vpop.xlane.xlu1 %2850 }
0x12e5   :  { %4913 = vpow2.f32 %v2686_v54  ;;  %v2852_v60 = vsub.f32 %v2848_v22, %v2851_v59 }
0x12e7   :  { %v2853_v0 = vmul.f32 1.442695, %v2852_v60  ;;  %v3636_v60 = vld [vmem:[%s5768_s7 + $0x18] sm:$0xff] }
0x12e8   :  { %v3032_v61 = vpop.xlane.xlu0 %3031  ;;  %4744 = vmatprep.subr.mxu1 %v3636_v60 }
0x12e9   :  { %v3033_v63 = vsub.f32 %v3029_v26, %v3032_v61  ;;  %4915 = vpow2.f32 %v2853_v0  ;;  %v3635_v61 = vld [vmem:[%s5768_s7 + $0x10] sm:$0xff]  ;;  %4745 = vmatpush3.msra.mxu1 %v3636_v60  ;;  %v3633_v0 = vld [vmem:[%s5768_s7] sm:$0xff] }
0x12ea   :  { %4746 = vmatprep.subr.mxu1 %v3635_v61 }
0x12eb   :  { %v3034_v5 = vmul.f32 1.442695, %v3033_v63  ;;  %4747 = vmatpush3.msra.mxu1 %v3635_v61  ;;  %v3634_v63 = vld [vmem:[%s5768_s7 + $0x8] sm:$0xff] }
0x12ec   :  { %v3199_v62 = vpop.xlane.xlu1 %3198  ;;  %4748 = vmatprep.subr.mxu1 %v3634_v63 }
0x12ed   :  { %v4910_v55 = vpop.eup %4909  ;;  %v3200_v1 = vsub.f32 %v3196_v32, %v3199_v62  ;;  %4917 = vpow2.f32 %v3034_v5  ;;  %4749 = vmatpush3.msra.mxu1 %v3634_v63  ;;  %v3887_v63 = vld [vmem:[%s5773_s18 + $0x30] sm:$0xff] }
0x12ee   :  { %v5592_v15 = vpop.eup %4911  ;;  %v2354_v56 = vsel %vm414_vm6, %v4910_v55, 0.0  ;;  %4750 = vmatprep.subr.mxu1 %v3633_v0 }
0x12ef   :  { %2355 = vadd.xlane.f32.xlu0 %v2354_v56  ;;  %v2521_v47 = vsel %vm414_vm6, %v5592_v15, 0.0  ;;  %v3201_v6 = vmul.f32 1.442695, %v3200_v1  ;;  %4751 = vmatpush3.msra.mxu1 %v3633_v0  ;;  %v3886_v0 = vld [vmem:[%s5773_s18 + $0x28] sm:$0xff] }
0x12f0   :  { %2522 = vadd.xlane.f32.xlu1 %v2521_v47  ;;  %v3366_v3 = vpop.xlane.xlu0 %3365  ;;  %v2694_v12 = vpop.permute.xlu1 %2693 }
0x12f1   :  { %v3367_v9 = vsub.f32 %v3363_v36, %v3366_v3  ;;  %4919 = vpow2.f32 %v3201_v6 }
0x12f2   :  { %v5597_v57 = vpop.eup %4913 }
0x12f3   :  { %v2688_v31 = vsel %vm414_vm6, %v5597_v57, 0.0  ;;  %v3368_v11 = vmul.f32 1.442695, %v3367_v9 }
0x12f4   :  { %2689 = vadd.xlane.f32.xlu0 %v2688_v31  ;;  %v2527_v7 = vpop.permute.xlu0 %2526 }
0x12f5   :  { %4921 = vpow2.f32 %v3368_v11 }
0x12f6   :  { %v4916_v58 = vpop.eup %4915 }
0x12f7   :  { %v2855_v17 = vsel %vm414_vm6, %v4916_v58, 0.0 }
0x12fa   :  { %v5605_v2 = vpop.eup %4917 }
0x12fb   :  { %v3036_v20 = vsel %vm414_vm6, %v5605_v2, 0.0 }
0x12fe   :  { %v5608_v18 = vpop.eup %4919 }
0x12ff   :  { %v3203_v19 = vsel %vm414_vm6, %v5608_v18, 0.0 }
0x1301   :  { %3041 = vrot.lane.b32.xlu1 %v5510_v48, %s5019_s0  ;;  %s5774_s0 = sld [smem:[#allocation17_spill]] }
0x1302   :  { %v5614_v21 = vpop.eup %4921 }
0x1303   :  { %v3370_v22 = vsel %vm414_vm6, %v5614_v21, 0.0 }
0x130a   :  { %3208 = vrot.lane.b32.xlu0 %v5510_v48, %s5023_s17  ;;  %s5778_s17 = sld [smem:[#allocation21_spill]] }
0x1321   :  { %v3533_v4 = vpop.xlane.xlu1 %3532 }
0x1322   :  { %v3534_v14 = vsub.f32 %v3530_v41, %v3533_v4 }
0x1324   :  { %v3535_v8 = vmul.f32 1.442695, %v3534_v14 }
0x1325   :  { %2856 = vadd.xlane.f32.xlu1 %v2855_v17  ;;  %v2861_v13 = vpop.permute.xlu1 %2860 }
0x1326   :  { %4923 = vpow2.f32 %v3535_v8 }
0x1329   :  { %3204 = vadd.xlane.f32.xlu1 %v3203_v19  ;;  %3037 = vadd.xlane.f32.xlu0 %v3036_v20 }
0x132d   :  { %3371 = vadd.xlane.f32.xlu0 %v3370_v22 }
0x1333   :  { %v5618_v24 = vpop.eup %4923 }
0x1334   :  { %v3537_v25 = vsel %vm414_vm6, %v5618_v24, 0.0 }
0x1335   :  { %3538 = vadd.xlane.f32.xlu0 %v3537_v25 }
0x133a   :  { %3375 = vrot.lane.b32.xlu1 %v5510_v48, %s5029_s22 }
0x134b   :  { %3542 = vrot.lane.b32.xlu0 %v5510_v48, %s5028_s8 }
0x1378   :  { %v2356_v26 = vpop.xlane.xlu0 %2355 }
0x1379   :  { %4925 = vrcp.f32 %v2356_v26  ;;  %v2523_v27 = vpop.xlane.xlu1 %2522 }
0x137a   :  { %4927 = vrcp.f32 %v2523_v27 }
0x137d   :  { %v2690_v28 = vpop.xlane.xlu0 %2689  ;;  %v3042_v16 = vpop.permute.xlu1 %3041 }
0x137e   :  { %4929 = vrcp.f32 %v2690_v28 }
0x1381   :  { %v3209_v35 = vpop.permute.xlu0 %3208 }
0x1386   :  { %v4926_v29 = vpop.eup %4925 }
0x1387   :  { %v2358_v30 = vmul.f32 %v4926_v29, %v4910_v55  ;;  %v4928_v32 = vpop.eup %4927 }
0x1388   :  { %v2525_v48 = vmul.f32 %v4928_v32, %v5592_v15 }
0x1389   :  { %4672 = vmatmul.mubr.msk.f32.vlgmr.msra.gmra.mxu0 %vm414_vm6, %v2358_v30 }
0x138a   :  { %4680 = vmatpush3.msra.mxu0 %v2527_v7  ;;  %4681 = vmatprep.mubr.msk.f32.mxu0 %vm5018_vm5, %v5017_v23 }
0x138b   :  { %4689 = vmatprep.subr.mxu0 %v5017_v23  ;;  %v4930_v33 = vpop.eup %4929 }
0x138c   :  { %v2692_v34 = vmul.f32 %v4930_v33, %v5597_v57 }
0x138d   :  { %4682 = vmatmul.mubr.msk.f32.vlgmr.msra.gmra.mxu0 %vm414_vm6, %v2525_v48 }
0x138e   :  { %4690 = vmatpush3.msra.mxu0 %v2694_v12  ;;  %4691 = vmatprep.mubr.msk.f32.mxu0 %vm5018_vm5, %v5017_v23 }
0x138f   :  { %4699 = vmatprep.subr.mxu0 %v5017_v23 }
0x1391   :  { %4692 = vmatmul.mubr.msk.f32.vlgmr.msra.gmra.mxu0 %vm414_vm6, %v2692_v34 }
0x1392   :  { %4700 = vmatpush3.msra.mxu0 %v2861_v13  ;;  %4701 = vmatprep.mubr.msk.f32.mxu0 %vm5018_vm5, %v5017_v23  ;;  %v4329_v13 = vld [vmem:[%s5769_s10] ss:$0 sm:$0xff] }
0x1393   :  { %4709 = vmatprep.subr.mxu0 %v5017_v23 }
0x13ae   :  { %v2857_v36 = vpop.xlane.xlu1 %2856 }
0x13af   :  { %4931 = vrcp.f32 %v2857_v36 }
0x13b2   :  { %v3038_v37 = vpop.xlane.xlu0 %3037  ;;  %v3205_v38 = vpop.xlane.xlu1 %3204 }
0x13b3   :  { %4933 = vrcp.f32 %v3038_v37 }
0x13b4   :  { %4935 = vrcp.f32 %v3205_v38 }
0x13b6   :  { %v3372_v39 = vpop.xlane.xlu0 %3371  ;;  %v3376_v51 = vpop.permute.xlu1 %3375 }
0x13b7   :  { %4937 = vrcp.f32 %v3372_v39 }
0x13bc   :  { %v4932_v40 = vpop.eup %4931 }
0x13bd   :  { %v2859_v41 = vmul.f32 %v4932_v40, %v4916_v58 }
0x13be   :  { %v3539_v42 = vpop.xlane.xlu0 %3538 }
0x13bf   :  { %4939 = vrcp.f32 %v3539_v42  ;;  %4702 = vmatmul.mubr.msk.f32.vlgmr.msra.gmra.mxu0 %vm414_vm6, %v2859_v41  ;;  %v3774_v41 = vld [vmem:[%s5770_s11 + $0x18] sm:$0xff]  ;;  %v3773_v42 = vld [vmem:[%s5770_s11 + $0x10] sm:$0xff] }
0x13c0   :  { %4710 = vmatpush3.msra.mxu0 %v3042_v16  ;;  %4711 = vmatprep.mubr.msk.f32.mxu0 %vm5018_vm5, %v5017_v23  ;;  %v4934_v45 = vpop.eup %4933 }
0x13c1   :  { %4719 = vmatprep.subr.mxu0 %v5017_v23  ;;  %v3040_v46 = vmul.f32 %v4934_v45, %v5605_v2  ;;  %v4936_v10 = vpop.eup %4935  ;;  %v3772_v45 = vld [vmem:[%s5770_s11 + $0x8] sm:$0xff] }
0x13c2   :  { %v3207_v49 = vmul.f32 %v4936_v10, %v5608_v18  ;;  %v3543_v54 = vpop.permute.xlu0 %3542 }
0x13c3   :  { %4712 = vmatmul.mubr.msk.f32.vlgmr.msra.gmra.mxu0 %vm414_vm6, %v3040_v46  ;;  %v3771_v46 = vld [vmem:[%s5770_s11] sm:$0xff] }
0x13c4   :  { %4720 = vmatpush3.msra.mxu0 %v3209_v35  ;;  %4721 = vmatprep.mubr.msk.f32.mxu0 %vm5018_vm5, %v5017_v23  ;;  %v4938_v50 = vpop.eup %4937 }
0x13c5   :  { %4729 = vmatprep.subr.mxu0 %v5017_v23  ;;  %v3374_v52 = vmul.f32 %v4938_v50, %v5614_v21 }
0x13c7   :  { %4722 = vmatmul.mubr.msk.f32.vlgmr.msra.gmra.mxu0 %vm414_vm6, %v3207_v49 }
0x13c8   :  { %4730 = vmatpush3.msra.mxu0 %v3376_v51  ;;  %4731 = vmatprep.mubr.msk.f32.mxu0 %vm5018_vm5, %v5017_v23 }
0x13c9   :  { %4739 = vmatprep.subr.mxu0 %v5017_v23 }
0x13cb   :  { %4732 = vmatmul.mubr.msk.f32.vlgmr.msra.gmra.mxu0 %vm414_vm6, %v3374_v52 }
0x13cc   :  { %v4940_v53 = vpop.eup %4939  ;;  %4740 = vmatpush3.msra.mxu0 %v3543_v54  ;;  %4741 = vmatprep.mubr.msk.f32.mxu0 %vm5018_vm5, %v5017_v23 }
0x13cd   :  { %v3541_v55 = vmul.f32 %v4940_v53, %v5618_v24  ;;  %4755 = vmatprep.subr.mxu0 %v3774_v41 }
0x13cf   :  { %4742 = vmatmul.mubr.msk.f32.vlgmr.msra.gmra.mxu0 %vm414_vm6, %v3541_v55  ;;  %v4332_v55 = vld [vmem:[%s5771_s15] ss:$0 sm:$0xff] }
0x13d0   :  { %4756 = vmatpush3.msra.mxu0 %v3774_v41 }
0x13d1   :  { %4757 = vmatprep.subr.mxu0 %v3773_v42 }
0x13d2   :  { %4758 = vmatpush3.msra.mxu0 %v3773_v42 }
0x13d3   :  { %4759 = vmatprep.subr.mxu0 %v3772_v45 }
0x13d4   :  { %4760 = vmatpush3.msra.mxu0 %v3772_v45 }
0x13d5   :  { %4761 = vmatprep.subr.mxu0 %v3771_v46 }
0x13d6   :  { %4762 = vmatpush3.msra.mxu0 %v3771_v46 }
0x13d7   :  { %4785 = vmatprep.subr.mxu0 %v5017_v23 }
0x1449   :  { %v2431_v15 = vpop.f32.mrf.mxu0 }
0x144b   :  { %v4673_v56 = vpop.f32.mrf.mxu0 }
0x144d   :  { %v2598_v47 = vpop.f32.mrf.mxu0 }
0x144e   :  { %2937 = vrot.lane.b32.xlu1 %v2598_v47, %s5030_s23 }
0x144f   :  { %v4683_v57 = vpop.f32.mrf.mxu0 }
0x1451   :  { %v2765_v31 = vpop.f32.mrf.mxu0 }
0x1452   :  { %2941 = vrot.lane.b32.xlu0 %v2765_v31, %s5031_s26  ;;  %v4333_v31 = vld [vmem:[%s5772_s16] ss:$0 sm:$0xff] }
0x1453   :  { %v4693_v59 = vpop.f32.mrf.mxu0 }
0x147f   :  { %v2932_v62 = vpop.f32.mrf.mxu0 }
0x1480   :  { %2945 = vrot.lane.b32.xlu0 %v2932_v62, %s5032_s28  ;;  %v3888_v62 = vld [vmem:[%s5773_s18 + $0x38] sm:$0xff] }
0x1481   :  { %v4703_v1 = vpop.f32.mrf.mxu0  ;;  %4766 = vmatprep.subr.mxu1 %v3888_v62 }
0x1482   :  { %v3885_v1 = vld [vmem:[%s5773_s18 + $0x20] sm:$0xff] }
0x1483   :  { %v3113_v3 = vpop.f32.mrf.mxu0 }
0x1485   :  { %v4713_v5 = vpop.f32.mrf.mxu0 }
0x1486   :  { %v3883_v5 = vld [vmem:[%s5773_s18 + $0x10] sm:$0xff] }
0x1487   :  { %v3280_v6 = vpop.f32.mrf.mxu0 }
0x1488   :  { %3619 = vrot.lane.b32.xlu1 %v3280_v6, %s5030_s23  ;;  %v3882_v6 = vld [vmem:[%s5773_s18 + $0x8] sm:$0xff] }
0x1489   :  { %v4723_v9 = vpop.f32.mrf.mxu0 }
0x148a   :  { %v3881_v9 = vld [vmem:[%s5773_s18] sm:$0xff] }
0x148b   :  { %v3447_v11 = vpop.f32.mrf.mxu0 }
0x148c   :  { %3623 = vrot.lane.b32.xlu1 %v3447_v11, %s5031_s26  ;;  %v4334_v11 = vld [vmem:[%s5774_s0] ss:$0 sm:$0xff] }
0x148d   :  { %v4733_v12 = vpop.f32.mrf.mxu0 }
0x148f   :  { %v3614_v58 = vpop.f32.mrf.mxu0 }
0x1490   :  { %3627 = vrot.lane.b32.xlu0 %v3614_v58, %s5032_s28 }
0x1491   :  { %v4743_v4 = vpop.f32.mrf.mxu0 }
0x14c0   :  { %v2938_v14 = vpop.permute.xlu1 %2937 }
0x14c1   :  { %v2948_v8 = vsel %vm414_vm6, %v2431_v15, %v2938_v14 }
0x14c4   :  { %v2942_v2 = vpop.permute.xlu0 %2941 }
0x14c5   :  { %v2949_v17 = vsel %vm1096_vm7, %v2948_v8, %v2942_v2 }
0x14f2   :  { %v2946_v18 = vpop.permute.xlu0 %2945 }
0x14f3   :  { %v2950_v19 = vsel %vm1098_vm8, %v2949_v17, %v2946_v18 }
0x14f4   :  { %4752 = vmatprep.mubr.msk.f32.mxu1 %vm272_vm4, %v2950_v19 }
0x14fa   :  { %v3620_v20 = vpop.permute.xlu1 %3619 }
0x14fb   :  { %v3630_v22 = vsel %vm414_vm6, %v3113_v3, %v3620_v20  ;;  %v3884_v3 = vld [vmem:[%s5773_s18 + $0x18] sm:$0xff] }
0x14fe   :  { %v3624_v21 = vpop.permute.xlu1 %3623 }
0x14ff   :  { %v3631_v24 = vsel %vm1096_vm7, %v3630_v22, %v3624_v21 }
0x1502   :  { %v3628_v25 = vpop.permute.xlu0 %3627 }
0x1503   :  { %v3632_v7 = vsel %vm1098_vm8, %v3631_v24, %v3628_v25 }
0x1504   :  { %4753 = vmatmul.mubr.msk.f32.vlgmr.msra.gmra.mxu1 %vm272_vm4, %v3632_v7 }
0x1505   :  { %4767 = vmatpush3.msra.mxu1 %v3888_v62 }
0x1506   :  { %4768 = vmatprep.subr.mxu1 %v3887_v63 }
0x1507   :  { %4769 = vmatpush3.msra.mxu1 %v3887_v63  ;;  %v4341_v63 = vld [vmem:[%s5778_s17] ss:$0 sm:$0xff] }
0x1508   :  { %4770 = vmatprep.subr.mxu1 %v3886_v0 }
0x1509   :  { %4771 = vmatpush3.msra.mxu1 %v3886_v0 }
0x150a   :  { %4772 = vmatprep.subr.mxu1 %v3885_v1 }
0x150b   :  { %4773 = vmatpush3.msra.mxu1 %v3885_v1 }
0x150c   :  { %4774 = vmatprep.subr.mxu1 %v3884_v3 }
0x150d   :  { %4775 = vmatpush3.msra.mxu1 %v3884_v3 }
0x150e   :  { %4776 = vmatprep.subr.mxu1 %v3883_v5 }
0x150f   :  { %4777 = vmatpush3.msra.mxu1 %v3883_v5 }
0x1510   :  { %4778 = vmatprep.subr.mxu1 %v3882_v6 }
0x1511   :  { %4779 = vmatpush3.msra.mxu1 %v3882_v6 }
0x1512   :  { %4780 = vmatprep.subr.mxu1 %v3881_v9 }
0x1513   :  { %4781 = vmatpush3.msra.mxu1 %v3881_v9 }
0x15c4   :  { %v4754_v26 = vpop.f32.mrf.mxu1 }
0x15c5   :  { %v3722_v27 = vadd.f32 %v4754_v26, %v4329_v13 }
0x15c6   :  { %v3716_v28 = vpop.f32.mrf.mxu1 }
0x15c7   :  { %v3726_v29 = vadd.f32 %v3722_v27, %v5487_v44  ;;  %v3717_v30 = vadd.f32 %v4329_v13, %v3716_v28 }
0x15c9   :  { %v3725_v32 = vadd.f32 %v3717_v30, %v5485_v43  ;;  %v3732_v48 = vsel %vm272_vm4, %v3726_v29, 0.0 }
0x15ca   :  { %3733 = vadd.xlane.f32.xlu0 %v3732_v48  ;;  %v4337_v48 = vld [vmem:[%s5775_s5] ss:$0 sm:$0xff] }
0x15cb   :  { %v3729_v33 = vsel %vm272_vm4, %v3725_v32, 0.0 }
0x15cc   :  { %3730 = vadd.xlane.f32.xlu1 %v3729_v33 }
0x1653   :  { %v3734_v34 = vpop.xlane.xlu0 %3733 }
0x1654   :  { %v3736_v16 = vmul.f32 0.03125, %v3734_v34 }
0x1655   :  { %v3731_v35 = vpop.xlane.xlu1 %3730 }
0x1656   :  { %v3738_v36 = vsub.f32 %v3726_v29, %v3736_v16  ;;  %v3735_v37 = vmul.f32 0.03125, %v3731_v35 }
0x1658   :  { %v3737_v38 = vsub.f32 %v3725_v32, %v3735_v37  ;;  %v3740_v44 = vmul.f32 %v3738_v36, %v3738_v36 }
0x165a   :  { %v3744_v39 = vsel %vm272_vm4, %v3740_v44, 0.0  ;;  %v3739_v43 = vmul.f32 %v3737_v38, %v3737_v38 }
0x165b   :  { %3745 = vadd.xlane.f32.xlu1 %v3744_v39 }
0x165c   :  { %v3741_v40 = vsel %vm272_vm4, %v3739_v43, 0.0 }
0x165d   :  { %3742 = vadd.xlane.f32.xlu0 %v3741_v40 }
0x16e4   :  { %v3746_v10 = vpop.xlane.xlu1 %3745 }
0x16e5   :  { %v3748_v49 = vmul.f32 0.03125, %v3746_v10 }
0x16e6   :  { %v3743_v50 = vpop.xlane.xlu0 %3742 }
0x16e7   :  { %v3750_v51 = vadd.f32 1e-12, %v3748_v49  ;;  %v3747_v52 = vmul.f32 0.03125, %v3743_v50 }
0x16e9   :  { %4941 = vrsqrt.f32 %v3750_v51  ;;  %v3749_v53 = vadd.f32 1e-12, %v3747_v52  ;;  %v4031_v51 = vld [vmem:[%s5776_s9 + $0x18] sm:$0xff]  ;;  %v4030_v52 = vld [vmem:[%s5776_s9 + $0x10] sm:$0xff] }
0x16eb   :  { %4943 = vrsqrt.f32 %v3749_v53  ;;  %v4029_v53 = vld [vmem:[%s5776_s9 + $0x8] sm:$0xff] }
0x16f6   :  { %v4942_v54 = vpop.eup %4941 }
0x16f7   :  { %v3754_v15 = vmul.f32 %v4942_v54, %v3738_v36  ;;  %v4028_v54 = vld [vmem:[%s5776_s9] sm:$0xff] }
0x16f8   :  { %v4944_v56 = vpop.eup %4943 }
0x16f9   :  { %v3753_v47 = vmul.f32 %v4944_v56, %v3737_v38  ;;  %v3762_v57 = vmul.f32 %v4332_v55, %v3754_v15 }
0x16fb   :  { %v3761_v59 = vmul.f32 %v4332_v55, %v3753_v47  ;;  %v3770_v61 = vadd.f32 %v4333_v31, %v3762_v57 }
0x16fd   :  { %v3769_v60 = vadd.f32 %v4333_v31, %v3761_v59 }
0x16ff   :  { %4763 = vmatprep.mubr.msk.f32.mxu0 %vm272_vm4, %v3769_v60 }
0x1700   :  { %4764 = vmatmul.mubr.msk.f32.vlgmr.msra.gmra.mxu0 %vm272_vm4, %v3770_v61 }
0x1701   :  { %4793 = vmatprep.mubr.msk.f32.mxu0 %vm5018_vm5, %v5017_v23  ;;  %4786 = vmatpush3.msra.mxu0 %v4031_v51 }
0x1702   :  { %4787 = vmatprep.subr.mxu0 %v5017_v23 }
0x1703   :  { %4788 = vmatpush3.msra.mxu0 %v4030_v52 }
0x1704   :  { %4789 = vmatprep.subr.mxu0 %v5017_v23 }
0x1705   :  { %4790 = vmatpush3.msra.mxu0 %v4029_v53 }
0x1706   :  { %4791 = vmatprep.subr.mxu0 %v5017_v23 }
0x1707   :  { %4792 = vmatpush3.msra.mxu0 %v4028_v54 }
0x1708   :  { %4796 = vmatprep.subr.mxu0 %v5017_v23 }
0x17c0   :  { %v4765_v12 = vpop.f32.mrf.mxu0 }
0x17c1   :  { %v3860_v58 = vadd.f32 %v4765_v12, %v4334_v11  ;;  %v4116_v12 = vld [vmem:[%s5207_s4 + $0x18] sm:$0xff] }
0x17c2   :  { %v3854_v4 = vpop.f32.mrf.mxu0 }
0x17c3   :  { %v3864_v14 = vmul.f32 %v3860_v58, %v3860_v58  ;;  %v3855_v2 = vadd.f32 %v4334_v11, %v3854_v4  ;;  %v4114_v4 = vld [vmem:[%s5207_s4 + $0x8] sm:$0xff] }
0x17c5   :  { %v3866_v8 = vmul.f32 %v3864_v14, %v3860_v58  ;;  %v3863_v17 = vmul.f32 %v3855_v2, %v3855_v2  ;;  %v4113_v14 = vld [vmem:[%s5207_s4] sm:$0xff] }
0x17c7   :  { %v3868_v18 = vmul.f32 0.044715, %v3866_v8  ;;  %v3865_v19 = vmul.f32 %v3863_v17, %v3855_v2 }
0x17c9   :  { %v3870_v20 = vadd.f32 %v3868_v18, %v3860_v58  ;;  %v3867_v21 = vmul.f32 0.044715, %v3865_v19 }
0x17cb   :  { %v3872_v22 = vmul.f32 0.7978846, %v3870_v20  ;;  %v3869_v24 = vadd.f32 %v3867_v21, %v3855_v2  ;;  %v4344_v20 = vld [vmem:[%s5212_s12] ss:$0 sm:$0xff] }
0x17cd   :  { %4945 = vtanh.f32 %v3872_v22  ;;  %v3871_v25 = vmul.f32 0.7978846, %v3869_v24 }
0x17cf   :  { %4947 = vtanh.f32 %v3871_v25 }
0x17da   :  { %v4946_v7 = vpop.eup %4945 }
0x17db   :  { %v3876_v13 = vadd.f32 1.0, %v4946_v7 }
0x17dc   :  { %v4948_v26 = vpop.eup %4947 }
0x17dd   :  { %v3875_v27 = vadd.f32 1.0, %v4948_v26  ;;  %v3878_v28 = vmul.f32 0.5, %v3876_v13 }
0x17df   :  { %v3877_v29 = vmul.f32 0.5, %v3875_v27  ;;  %v3880_v32 = vmul.f32 %v3878_v28, %v3860_v58  ;;  %v4115_v58 = vld [vmem:[%s5207_s4 + $0x10] sm:$0xff]  ;;  %s5033_s4 = smov [#allocation2]  }
0x17e0   :  { %s4211_s21 = sshll.u32 %s5033_s4, 4  ;;  %s4212_s21 = int_to_ptr.vmem [resolvable:$true] %s4211_s21 }
0x17e1   :  { %v3879_v30 = vmul.f32 %v3877_v29, %v3855_v2  ;;  %v4342_v2 = vld [vmem:[%s5202_s27] ss:$0 sm:$0xff]  ;;  %s4959_s27 = scalar_lea.vmem %s4212_s21, 32  ;;  %p4964_p1 = scmp.lt.s32.totalorder %s4212_s21, %s4212_s21 }
0x17e2   :  { %p4960_p0 = scmp.ne.s32.totalorder %s4212_s21, %s4959_s27  ;;  %p4965_p2 = scmp.lt.s32.totalorder %s4959_s27, %s4959_s27 }
0x17e3   :  { %4782 = vmatprep.mubr.msk.f32.mxu1 %vm2049_vm9, %v3879_v30 }
0x17e4   :  { %4783 = vmatmul.mubr.msk.f32.vlgmr.msra.gmra.mxu1 %vm2049_vm9, %v3880_v32  ;;  %p4966_p3 = por %p4965_p2, %p4964_p1 }
0x17e6   :  { %p4967_p4 = pnand %p4966_p3, %p4960_p0 }
0x18a4   :  { %v4784_v33 = vpop.f32.mrf.mxu1 }
0x18a5   :  { %v3974_v34 = vadd.f32 %v4784_v33, %v4337_v48 }
0x18a6   :  { %v3968_v16 = vpop.f32.mrf.mxu1 }
0x18a7   :  { %v3978_v35 = vadd.f32 %v3974_v34, %v3770_v61  ;;  %v3969_v36 = vadd.f32 %v4337_v48, %v3968_v16 }
0x18a9   :  { %v3977_v37 = vadd.f32 %v3969_v36, %v3769_v60  ;;  %v3984_v38 = vsel %vm272_vm4, %v3978_v35, 0.0  ;;  %v4340_v60 = vld [vmem:[%s5777_s13] ss:$0 sm:$0xff] }
0x18aa   :  { %3985 = vadd.xlane.f32.xlu0 %v3984_v38 }
0x18ab   :  { %v3981_v44 = vsel %vm272_vm4, %v3977_v37, 0.0 }
0x18ac   :  { %3982 = vadd.xlane.f32.xlu1 %v3981_v44 }
0x1933   :  { %v3986_v39 = vpop.xlane.xlu0 %3985 }
0x1934   :  { %v3988_v43 = vmul.f32 0.03125, %v3986_v39 }
0x1935   :  { %v3983_v40 = vpop.xlane.xlu1 %3982 }
0x1936   :  { %v3990_v41 = vsub.f32 %v3978_v35, %v3988_v43  ;;  %v3987_v42 = vmul.f32 0.03125, %v3983_v40 }
0x1938   :  { %v3989_v45 = vsub.f32 %v3977_v37, %v3987_v42  ;;  %v3992_v46 = vmul.f32 %v3990_v41, %v3990_v41 }
0x193a   :  { %v3996_v10 = vsel %vm272_vm4, %v3992_v46, 0.0  ;;  %v3991_v49 = vmul.f32 %v3989_v45, %v3989_v45 }
0x193b   :  { %3997 = vadd.xlane.f32.xlu0 %v3996_v10 }
0x193c   :  { %v3993_v50 = vsel %vm272_vm4, %v3991_v49, 0.0 }
0x193d   :  { %3994 = vadd.xlane.f32.xlu1 %v3993_v50 }
0x19c4   :  { %v3998_v55 = vpop.xlane.xlu0 %3997 }
0x19c5   :  { %v4000_v15 = vmul.f32 0.03125, %v3998_v55 }
0x19c6   :  { %v3995_v56 = vpop.xlane.xlu1 %3994 }
0x19c7   :  { %v4002_v47 = vadd.f32 1e-12, %v4000_v15  ;;  %v3999_v57 = vmul.f32 0.03125, %v3995_v56 }
0x19c9   :  { %4949 = vrsqrt.f32 %v4002_v47  ;;  %v4001_v31 = vadd.f32 1e-12, %v3999_v57 }
0x19cb   :  { %4951 = vrsqrt.f32 %v4001_v31 }
0x19d6   :  { %v4950_v59 = vpop.eup %4949 }
0x19d7   :  { %v4006_v61 = vmul.f32 %v4950_v59, %v3990_v41 }
0x19d8   :  { %v4952_v62 = vpop.eup %4951 }
0x19d9   :  { %v4005_v0 = vmul.f32 %v4952_v62, %v3989_v45  ;;  %v4014_v1 = vmul.f32 %v4340_v60, %v4006_v61 }
0x19db   :  { %v4013_v3 = vmul.f32 %v4340_v60, %v4005_v0  ;;  %v4022_v5 = vadd.f32 %v4341_v63, %v4014_v1 }
0x19dd   :  { %v4021_v6 = vadd.f32 %v4341_v63, %v4013_v3  ;;  %v4024_v9 = vrot.slane %v4022_v5, 7 }
0x19df   :  { %v4027_v11 = vsel %vm4026_vm10, %v4021_v6, %v4024_v9 }
0x19e0   :  { %4794 = vmatmul.mubr.msk.f32.vlgmr.msra.gmra.mxu0 %vm272_vm4, %v4027_v11 }
0x19e1   :  { %4804 = vmatprep.mubr.msk.f32.mxu0 %vm5018_vm5, %v5017_v23  ;;  %4797 = vmatpush3.msra.mxu0 %v4116_v12 }
0x19e2   :  { %4798 = vmatprep.subr.mxu0 %v5017_v23 }
0x19e3   :  { %4799 = vmatpush3.msra.mxu0 %v4115_v58 }
0x19e4   :  { %4800 = vmatprep.subr.mxu0 %v5017_v23 }
0x19e5   :  { %4801 = vmatpush3.msra.mxu0 %v4114_v4 }
0x19e6   :  { %4802 = vmatprep.subr.mxu0 %v5017_v23 }
0x19e7   :  { %4803 = vmatpush3.msra.mxu0 %v4113_v14 }
0x1aa0   :  { %v4108_v8 = vpop.f32.mrf.mxu0 }
0x1aa1   :  { %v4109_v17 = vadd.f32 %v4342_v2, %v4108_v8 }
0x1aa2   :  { %v4795_v18 = vpop.f32.mrf.mxu0 }
0x1aa3   :  { %4953 = vtanh.f32 %v4109_v17 }
0x1ab0   :  { %v4954_v19 = vpop.eup %4953 }
0x1ab1   :  { %4805 = vmatmul.mubr.msk.f32.vlgmr.msra.gmra.mxu0 %vm272_vm4, %v4954_v19 }
0x1b71   :  { %v4193_v21 = vpop.f32.mrf.mxu0 }
0x1b72   :  { %v4194_v22 = vadd.f32 %v4344_v20, %v4193_v21 }
0x1b73   :  { %v4806_v24 = vpop.f32.mrf.mxu0 }
0x1b74   :  { %v4346_v25 = vmul.f32 -1.442695, %v4194_v22 }
0x1b76   :  { %4955 = vpow2.f32 %v4346_v25 }
0x1b83   :  { %v4956_v7 = vpop.eup %4955 }
0x1b84   :  { %v4200_v13 = vadd.f32 1.0, %v4956_v7 }
0x1b86   :  { %4957 = vrcp.f32 %v4200_v13 }
0x1b93   :  { %v4958_v23 = vpop.eup %4957 }
0x1b94   :  { %4204 = vst.msk [vmem:[#allocation2] sm:$0x3] %vm4203_vm11, %v4958_v23 }
0x1b95   :  { %4970 = shalt.err (!%p4967_p4)
}
0x1b96   :  { %4214 = dma.vmem_to_hbm [thread:$0]  %s4212_s21, 32, %s5217_s20, [#allocation3]  }
0x1b97   :  { %4979 = dma.done.wait [#allocation3], 32  }
0x1b98   :  { %4980 = vsyncadd [#allocation3], 4294967264 }
0x1b99   :  { %4218 = vsyncpa [#allocation3], 1 }

</bundles_post_ra>
